<compile_context>
chip_gen: v6e
topology: v6e:2x2x1
jax: 0.10.0
libtpu: 0.0.40
codegen_flags: <defaults>
</compile_context>

<pallas_src>
import functools

import numpy as np
import jax
import jax.numpy as jnp
from jax.experimental import pallas as pl
from jax.experimental.pallas import tpu as pltpu

BN_EPS = 1e-5


# ---------------------------------------------------------------------------
# The single fused kernel (one batch element per grid step)
# ---------------------------------------------------------------------------

def _fused_forward_kernel(x_ref, w_ref, sh_ref, pool_ref, fcwb_ref, o_ref,
                          *, K, pad, n_res, P):
    L = x_ref.shape[1]          # sequence length (length-preserving convs)
    E = x_ref.shape[2]          # embedding_dim
    C = w_ref.shape[1]          # reduced channel count

    def conv_bn_relu(a, w_off, cin, layer, residual=None):
        """Conv1d(stride=1,'same') + BN (scale folded into weights, shift in
        sh_ref) [+ residual] + ReLU as K accumulated MXU matmuls."""
        if pad:
            z = jnp.zeros((pad, a.shape[1]), jnp.float32)
            a_pad = jnp.concatenate([z, a, z], axis=0)       # pad once
        else:
            a_pad = a
        L_out = a.shape[0] + 2 * pad - K + 1
        acc = None
        for k in range(K):                                   # K static, small
            wk = w_ref[w_off + k * cin:w_off + (k + 1) * cin, :]   # (cin, C)
            d = jnp.dot(a_pad[k:k + L_out, :], wk,
                        preferred_element_type=jnp.float32)
            acc = d if acc is None else acc + d
        y = acc + sh_ref[layer:layer + 1, :]
        if residual is not None:
            y = y + residual
        return jnp.maximum(y, 0.0)

    def maxpool(a):
        """MaxPool1d(K, stride=1, padding=pad) with -inf padding."""
        if pad:
            ninf = jnp.full((pad, a.shape[1]), -jnp.inf, jnp.float32)
            a_pad = jnp.concatenate([ninf, a, ninf], axis=0)
        else:
            a_pad = a
        L_out = a.shape[0] + 2 * pad - K + 1
        m = a_pad[0:L_out, :]
        for k in range(1, K):
            m = jnp.maximum(m, a_pad[k:k + L_out, :])
        return m

    # conv1 + bn1 + relu, then maxpool
    a = conv_bn_relu(x_ref[0], 0, E, 0)                      # (L, C)
    a = maxpool(a)                                           # (L, C)

    # residual blocks (identity shortcut: stride=1 and Cin == Cout)
    base = K * E
    for j in range(n_res):
        off_a = base + (2 * j) * K * C
        off_b = base + (2 * j + 1) * K * C
        h = conv_bn_relu(a, off_a, C, 1 + 2 * j)
        a = conv_bn_relu(h, off_b, C, 2 + 2 * j, residual=a)

    # Dropout = identity (inference).  Adaptive avg pool as one matmul, then
    # fc as P accumulated (1, C) @ (C, out) dots; fcwb's last row is the bias.
    pooled = jnp.dot(pool_ref[...], a, preferred_element_type=jnp.float32)  # (P, C)
    logits = fcwb_ref[P * C:P * C + 1, :]                                   # (1, out)
    for p in range(P):
        logits = logits + jnp.dot(pooled[p:p + 1, :],
                                  fcwb_ref[p * C:(p + 1) * C, :],
                                  preferred_element_type=jnp.float32)
    o_ref[0] = logits.astype(o_ref.dtype)


def bacteria_nn_forward(x, kparams, *, kernel_size, padding):
    """x: (B, L, embedding_dim) float32 — the tensor PyTorch receives before
    its .permute(0, 2, 1) (a layout no-op in this channels-last convention)."""
    # TODO(synk): only stride == 1 is implemented (the example config); the
    # 1x1-conv shortcut branch of CNNResidualBlock is never taken here.
    B, L, E = x.shape
    K, pad = kernel_size, padding
    # Guards for the assumptions baked into the kernel (review correctness items).
    assert 2 * pad == K - 1, "identity residual shortcut needs length-preserving convs"
    assert pad < K, "MaxPool1d -inf padding must not create empty windows"

    w_all = kparams["w_all"]
    shift_all = kparams["shift_all"]
    pool_mat = kparams["pool_mat"]
    fcwb = kparams["fcwb"]

    C = w_all.shape[1]
    n_res = (w_all.shape[0] - K * E) // (2 * K * C)
    assert w_all.shape[0] == K * E + 2 * n_res * K * C
    assert shift_all.shape == (1 + 2 * n_res, C)
    P = pool_mat.shape[0]
    assert pool_mat.shape[1] == L, "pool matrix built for a different seq_len"
    out_dim = fcwb.shape[1]
    assert fcwb.shape[0] == P * C + 1

    kernel = functools.partial(_fused_forward_kernel,
                               K=K, pad=pad, n_res=n_res, P=P)
    out = pl.pallas_call(
        kernel,
        out_shape=jax.ShapeDtypeStruct((B, 1, out_dim), jnp.float32),
        grid=(B,),
        in_specs=[
            pl.BlockSpec((1, L, E), lambda b: (b, 0, 0)),        # per-batch slice
            pl.BlockSpec(w_all.shape, lambda b: (0, 0)),         # resident weights
            pl.BlockSpec(shift_all.shape, lambda b: (0, 0)),
            pl.BlockSpec(pool_mat.shape, lambda b: (0, 0)),
            pl.BlockSpec(fcwb.shape, lambda b: (0, 0)),
        ],
        out_specs=pl.BlockSpec((1, 1, out_dim), lambda b: (b, 0, 0)),
        compiler_params=pltpu.CompilerParams(
            dimension_semantics=("parallel",),       # 2nd TensorCore on v7x
            vmem_limit_bytes=32 * 1024 * 1024,
        ),
    )(x, w_all, shift_all, pool_mat, fcwb)
    return out.reshape(B, out_dim)


# ---------------------------------------------------------------------------
# Parameter construction (deterministic, synthetic); packed for the kernel
# ---------------------------------------------------------------------------

def _init_conv(key, cin, cout, k):
    kw, kb = jax.random.split(key)
    w_pt = jax.random.normal(kw, (cout, cin, k), jnp.float32) * 0.1  # PyTorch (Cout,Cin,K)
    b = jax.random.normal(kb, (cout,), jnp.float32) * 0.1
    return w_pt, b


def _init_bn(key, c):
    k1, k2, k3, k4 = jax.random.split(key, 4)
    gamma = 1.0 + 0.1 * jax.random.normal(k1, (c,), jnp.float32)
    beta = 0.1 * jax.random.normal(k2, (c,), jnp.float32)
    mean = 0.1 * jax.random.normal(k3, (c,), jnp.float32)
    var = jax.random.uniform(k4, (c,), jnp.float32, minval=0.5, maxval=1.5)
    return gamma, beta, mean, var


def _fold_conv_bn(w_pt, b, gamma, beta, mean, var):
    """Fold BN (inference) + conv bias: rows k*Cin + c, scale into columns."""
    scale = gamma / jnp.sqrt(var + BN_EPS)                    # (Cout,)
    shift = beta + (b - mean) * scale                         # (Cout,)
    cout = w_pt.shape[0]
    w_rows = jnp.transpose(w_pt, (2, 1, 0)).reshape(-1, cout) * scale[None, :]
    return w_rows, shift


def adaptive_pool_matrix(L, P):
    """Row p averages positions [floor(p*L/P), ceil((p+1)*L/P)) — PyTorch
    AdaptiveAvgPool1d semantics.  Built once at init (host side)."""
    m = np.zeros((P, L), np.float32)
    for p in range(P):
        s = (p * L) // P
        e = -(-((p + 1) * L) // P)
        m[p, s:e] = 1.0 / (e - s)
    return jnp.asarray(m)


def init_params(key, *, embedding_dim, output_dim, kernel_size, padding,
                avg_poolsize, embedding_reduction_factor, resblock_num, seq_len):
    K, pad = kernel_size, padding
    assert 2 * pad == K - 1, "identity residual shortcut needs length-preserving convs"
    C = embedding_dim // embedding_reduction_factor
    L1 = seq_len + 2 * pad - K + 1       # after conv1 (stride 1)
    L2 = L1 + 2 * pad - K + 1            # after maxpool (stride 1)

    keys = jax.random.split(key, 3 + 4 * resblock_num)
    ki = iter(keys)

    w1_pt, b1 = _init_conv(next(ki), embedding_dim, C, K)
    bn1 = _init_bn(next(ki), C)
    w_rows1, sh1 = _fold_conv_bn(w1_pt, b1, *bn1)
    w_parts, shifts = [w_rows1], [sh1]

    ref = dict(conv1=(w1_pt, b1) + bn1, resblocks=[])
    for _ in range(resblock_num):
        wa_pt, ba = _init_conv(next(ki), C, C, K)
        bna = _init_bn(next(ki), C)
        wb_pt, bb = _init_conv(next(ki), C, C, K)
        bnb = _init_bn(next(ki), C)
        wra, sha = _fold_conv_bn(wa_pt, ba, *bna)
        wrb, shb = _fold_conv_bn(wb_pt, bb, *bnb)
        w_parts += [wra, wrb]
        shifts += [sha, shb]
        ref["resblocks"].append(((wa_pt, ba) + bna, (wb_pt, bb) + bnb))

    # fc: PyTorch weight is (out_dim, C*P), flattened from (B, C, P) as c*P + p.
    # The kernel accumulates over p with pooled rows in p-major order -> permute.
    kw, kb = jax.random.split(next(ki))
    fc_pt = jax.random.normal(kw, (output_dim, C * avg_poolsize), jnp.float32) * 0.1
    fc_b = jax.random.normal(kb, (output_dim,), jnp.float32) * 0.1
    fc_perm = jnp.transpose(fc_pt.reshape(output_dim, C, avg_poolsize),
                            (2, 1, 0)).reshape(avg_poolsize * C, output_dim)

    kparams = dict(
        w_all=jnp.concatenate(w_parts, axis=0),               # (K*E + 2*nres*K*C, C)
        shift_all=jnp.stack(shifts, axis=0),                  # (1 + 2*nres, C)
        pool_mat=adaptive_pool_matrix(L2, avg_poolsize),      # (P, L2)
        fcwb=jnp.concatenate([fc_perm, fc_b[None, :]], axis=0),  # (P*C + 1, out)
    )
    ref["fc"] = (fc_pt, fc_b)
    return kparams, ref


# ---------------------------------------------------------------------------
# Pure-JAX reference (from PyTorch-layout weights) for correctness checking
# ---------------------------------------------------------------------------

def _ref_conv_bn(a, w_pt, b, gamma, beta, mean, var, *, pad, relu, residual=None):
    K = w_pt.shape[2]
    L_out = a.shape[1] + 2 * pad - K + 1
    ap = jnp.pad(a, ((0, 0), (pad, pad), (0, 0)))
    y = b[None, None, :]
    for k in range(K):
        y = y + jnp.einsum("blc,oc->blo", ap[:, k:k + L_out, :], w_pt[:, :, k],
                           precision="highest")
    y = (y - mean) / jnp.sqrt(var + BN_EPS) * gamma + beta
    if residual is not None:
        y = y + residual
    if relu:
        y = jnp.maximum(y, 0.0)
    return y


def _ref_maxpool(a, *, K, pad):
    L_out = a.shape[1] + 2 * pad - K + 1
    ap = jnp.pad(a, ((0, 0), (pad, pad), (0, 0)), constant_values=-jnp.inf)
    m = ap[:, 0:L_out, :]
    for k in range(1, K):
        m = jnp.maximum(m, ap[:, k:k + L_out, :])
    return m


def reference_forward(x, ref, *, kernel_size, padding, avg_poolsize):
    K, pad, P = kernel_size, padding, avg_poolsize
    a = _ref_conv_bn(x, *ref["conv1"], pad=pad, relu=True)
    a = _ref_maxpool(a, K=K, pad=pad)
    for blk_a, blk_b in ref["resblocks"]:
        h = _ref_conv_bn(a, *blk_a, pad=pad, relu=True)
        a = _ref_conv_bn(h, *blk_b, pad=pad, relu=True, residual=a)
    B, L, C = a.shape
    bins = []
    for p in range(P):
        s = (p * L) // P
        e = -(-((p + 1) * L) // P)
        bins.append(jnp.mean(a[:, s:e, :], axis=1, keepdims=True))
    pooled = jnp.concatenate(bins, axis=1)                      # (B, P, C)
    flat = jnp.transpose(pooled, (0, 2, 1)).reshape(B, C * P)   # PyTorch c*P + p order
    fc_w, fc_b = ref["fc"]
    return jnp.dot(flat, fc_w.T, precision="highest") + fc_b


# ---------------------------------------------------------------------------

if __name__ == "__main__":
    cfg = dict(
        embedding_dim=32,
        output_dim=8,
        kernel_size=3,
        padding=1,
        avg_poolsize=4,
        embedding_reduction_factor=2,
        resblock_num=2,
        stride=1,
    )
    B, L = 2, 32

    key = jax.random.PRNGKey(0)
    kx, kp = jax.random.split(key)
    x = jax.random.normal(kx, (B, L, cfg["embedding_dim"]), jnp.float32)

    kparams, ref_params = init_params(
        kp,
        embedding_dim=cfg["embedding_dim"],
        output_dim=cfg["output_dim"],
        kernel_size=cfg["kernel_size"],
        padding=cfg["padding"],
        avg_poolsize=cfg["avg_poolsize"],
        embedding_reduction_factor=cfg["embedding_reduction_factor"],
        resblock_num=cfg["resblock_num"],
        seq_len=L,
    )

    fwd = jax.jit(functools.partial(bacteria_nn_forward,
                                    kernel_size=cfg["kernel_size"],
                                    padding=cfg["padding"]))
    out = jax.block_until_ready(fwd(x, kparams))
    assert out.shape == (B, cfg["output_dim"]), out.shape
    assert bool(jnp.all(jnp.isfinite(out)))

    ref = reference_forward(x, ref_params,
                            kernel_size=cfg["kernel_size"],
                            padding=cfg["padding"],
                            avg_poolsize=cfg["avg_poolsize"])
    # Tightened from 5e-2 -> 5e-3 (10x): catches any indexing/layout regression
    # (those produce O(1) errors) while leaving headroom for MXU f32
    # pass-rounding differences vs the precision="highest" XLA reference
    # across TPU generations.
    assert jnp.allclose(out, ref, atol=5e-3, rtol=5e-3), \
        float(jnp.max(jnp.abs(out - ref)))
    print("KERNEL_OK")
</pallas_src>

<mosaic_0001>
module attributes {stable_mosaic.version = 11 : i64} {
  func.func @_fused_forward_kernel(%arg0: i32, %arg1: memref<1x32x32xf32, #tpu.memory_space<vmem>>, %arg2: memref<288x16xf32, #tpu.memory_space<vmem>>, %arg3: memref<5x16xf32, #tpu.memory_space<vmem>>, %arg4: memref<4x32xf32, #tpu.memory_space<vmem>>, %arg5: memref<65x8xf32, #tpu.memory_space<vmem>>, %arg6: memref<1x1x8xf32, #tpu.memory_space<vmem>>) attributes {dimension_semantics = [#tpu.dimension_semantics<parallel>], iteration_bounds = array<i64: 2>, scalar_prefetch = 0 : i64, scratch_operands = 0 : i64, tpu.core_type = #tpu.core_type<tc>, window_params = [{transform_indices = @transform_0, window_bounds = array<i64: 1, 32, 32>}, {pipeline_mode = #tpu.pipeline_mode<synchronous>, transform_indices = @transform_1, window_bounds = array<i64: 288, 16>}, {pipeline_mode = #tpu.pipeline_mode<synchronous>, transform_indices = @transform_2, window_bounds = array<i64: 5, 16>}, {pipeline_mode = #tpu.pipeline_mode<synchronous>, transform_indices = @transform_3, window_bounds = array<i64: 4, 32>}, {pipeline_mode = #tpu.pipeline_mode<synchronous>, transform_indices = @transform_4, window_bounds = array<i64: 65, 8>}, {transform_indices = @transform_5, window_bounds = array<i64: 1, 1, 8>}]} {
    %c0 = arith.constant 0 : index
    %c0_0 = arith.constant 0 : index
    %c0_1 = arith.constant 0 : index
    %0 = vector.load %arg1[%c0, %c0_0, %c0_1] : memref<1x32x32xf32, #tpu.memory_space<vmem>>, vector<1x32x32xf32>
    %1 = vector.shape_cast %0 : vector<1x32x32xf32> to vector<32x32xf32>
    %cst = arith.constant 0.000000e+00 : f32
    %2 = vector.broadcast %cst : f32 to vector<1x32xf32>
    %3 = tpu.concatenate %2, %1, %2 in 0 : vector<1x32xf32>, vector<32x32xf32>, vector<1x32xf32> -> vector<34x32xf32>
    %c0_2 = arith.constant 0 : index
    %c0_3 = arith.constant 0 : index
    %4 = vector.load %arg2[%c0_2, %c0_3] : memref<288x16xf32, #tpu.memory_space<vmem>>, vector<32x16xf32>
    %5 = vector.extract_strided_slice %3 {offsets = [0, 0], sizes = [32, 32], strides = [1, 1]} : vector<34x32xf32> to vector<32x32xf32>
    %cst_4 = arith.constant dense<0.000000e+00> : vector<32x16xf32>
    %6 = tpu.matmul %5, %4, %cst_4 {dimension_numbers = #tpu.dot_dimension_numbers<[1], [0], [0], [1], [0, 0, 1, 1], [], []>} : vector<32x32xf32>, vector<32x16xf32>, vector<32x16xf32> -> vector<32x16xf32>
    %c32 = arith.constant 32 : index
    %c0_5 = arith.constant 0 : index
    %7 = vector.load %arg2[%c32, %c0_5] : memref<288x16xf32, #tpu.memory_space<vmem>>, vector<32x16xf32>
    %8 = vector.extract_strided_slice %3 {offsets = [1, 0], sizes = [32, 32], strides = [1, 1]} : vector<34x32xf32> to vector<32x32xf32>
    %cst_6 = arith.constant dense<0.000000e+00> : vector<32x16xf32>
    %9 = tpu.matmul %8, %7, %cst_6 {dimension_numbers = #tpu.dot_dimension_numbers<[1], [0], [0], [1], [0, 0, 1, 1], [], []>} : vector<32x32xf32>, vector<32x16xf32>, vector<32x16xf32> -> vector<32x16xf32>
    %10 = arith.addf %6, %9 : vector<32x16xf32>
    %c64 = arith.constant 64 : index
    %c0_7 = arith.constant 0 : index
    %11 = vector.load %arg2[%c64, %c0_7] : memref<288x16xf32, #tpu.memory_space<vmem>>, vector<32x16xf32>
    %12 = vector.extract_strided_slice %3 {offsets = [2, 0], sizes = [32, 32], strides = [1, 1]} : vector<34x32xf32> to vector<32x32xf32>
    %cst_8 = arith.constant dense<0.000000e+00> : vector<32x16xf32>
    %13 = tpu.matmul %12, %11, %cst_8 {dimension_numbers = #tpu.dot_dimension_numbers<[1], [0], [0], [1], [0, 0, 1, 1], [], []>} : vector<32x32xf32>, vector<32x16xf32>, vector<32x16xf32> -> vector<32x16xf32>
    %14 = arith.addf %10, %13 : vector<32x16xf32>
    %c0_9 = arith.constant 0 : index
    %c0_10 = arith.constant 0 : index
    %15 = vector.load %arg3[%c0_9, %c0_10] : memref<5x16xf32, #tpu.memory_space<vmem>>, vector<1x16xf32>
    %16 = vector.broadcast %15 : vector<1x16xf32> to vector<32x16xf32>
    %17 = arith.addf %14, %16 : vector<32x16xf32>
    %cst_11 = arith.constant 0.000000e+00 : f32
    %18 = vector.broadcast %cst_11 : f32 to vector<32x16xf32>
    %19 = arith.maximumf %17, %18 : vector<32x16xf32>
    %cst_12 = arith.constant 0xFF800000 : f32
    %20 = vector.broadcast %cst_12 : f32 to vector<1x16xf32>
    %21 = tpu.concatenate %20, %19, %20 in 0 : vector<1x16xf32>, vector<32x16xf32>, vector<1x16xf32> -> vector<34x16xf32>
    %22 = vector.extract_strided_slice %21 {offsets = [0, 0], sizes = [32, 16], strides = [1, 1]} : vector<34x16xf32> to vector<32x16xf32>
    %23 = vector.extract_strided_slice %21 {offsets = [1, 0], sizes = [32, 16], strides = [1, 1]} : vector<34x16xf32> to vector<32x16xf32>
    %24 = arith.maximumf %22, %23 : vector<32x16xf32>
    %25 = vector.extract_strided_slice %21 {offsets = [2, 0], sizes = [32, 16], strides = [1, 1]} : vector<34x16xf32> to vector<32x16xf32>
    %26 = arith.maximumf %24, %25 : vector<32x16xf32>
    %cst_13 = arith.constant 0.000000e+00 : f32
    %27 = vector.broadcast %cst_13 : f32 to vector<1x16xf32>
    %28 = tpu.concatenate %27, %26, %27 in 0 : vector<1x16xf32>, vector<32x16xf32>, vector<1x16xf32> -> vector<34x16xf32>
    %c96 = arith.constant 96 : index
    %c0_14 = arith.constant 0 : index
    %29 = vector.load %arg2[%c96, %c0_14] : memref<288x16xf32, #tpu.memory_space<vmem>>, vector<16x16xf32>
    %30 = vector.extract_strided_slice %28 {offsets = [0, 0], sizes = [32, 16], strides = [1, 1]} : vector<34x16xf32> to vector<32x16xf32>
    %cst_15 = arith.constant dense<0.000000e+00> : vector<32x16xf32>
    %31 = tpu.matmul %30, %29, %cst_15 {dimension_numbers = #tpu.dot_dimension_numbers<[1], [0], [0], [1], [0, 0, 1, 1], [], []>} : vector<32x16xf32>, vector<16x16xf32>, vector<32x16xf32> -> vector<32x16xf32>
    %c112 = arith.constant 112 : index
    %c0_16 = arith.constant 0 : index
    %32 = vector.load %arg2[%c112, %c0_16] : memref<288x16xf32, #tpu.memory_space<vmem>>, vector<16x16xf32>
    %33 = vector.extract_strided_slice %28 {offsets = [1, 0], sizes = [32, 16], strides = [1, 1]} : vector<34x16xf32> to vector<32x16xf32>
    %cst_17 = arith.constant dense<0.000000e+00> : vector<32x16xf32>
    %34 = tpu.matmul %33, %32, %cst_17 {dimension_numbers = #tpu.dot_dimension_numbers<[1], [0], [0], [1], [0, 0, 1, 1], [], []>} : vector<32x16xf32>, vector<16x16xf32>, vector<32x16xf32> -> vector<32x16xf32>
    %35 = arith.addf %31, %34 : vector<32x16xf32>
    %c128 = arith.constant 128 : index
    %c0_18 = arith.constant 0 : index
    %36 = vector.load %arg2[%c128, %c0_18] : memref<288x16xf32, #tpu.memory_space<vmem>>, vector<16x16xf32>
    %37 = vector.extract_strided_slice %28 {offsets = [2, 0], sizes = [32, 16], strides = [1, 1]} : vector<34x16xf32> to vector<32x16xf32>
    %cst_19 = arith.constant dense<0.000000e+00> : vector<32x16xf32>
    %38 = tpu.matmul %37, %36, %cst_19 {dimension_numbers = #tpu.dot_dimension_numbers<[1], [0], [0], [1], [0, 0, 1, 1], [], []>} : vector<32x16xf32>, vector<16x16xf32>, vector<32x16xf32> -> vector<32x16xf32>
    %39 = arith.addf %35, %38 : vector<32x16xf32>
    %c1 = arith.constant 1 : index
    %c0_20 = arith.constant 0 : index
    %40 = vector.load %arg3[%c1, %c0_20] : memref<5x16xf32, #tpu.memory_space<vmem>>, vector<1x16xf32>
    %41 = vector.broadcast %40 : vector<1x16xf32> to vector<32x16xf32>
    %42 = arith.addf %39, %41 : vector<32x16xf32>
    %cst_21 = arith.constant 0.000000e+00 : f32
    %43 = vector.broadcast %cst_21 : f32 to vector<32x16xf32>
    %44 = arith.maximumf %42, %43 : vector<32x16xf32>
    %cst_22 = arith.constant 0.000000e+00 : f32
    %45 = vector.broadcast %cst_22 : f32 to vector<1x16xf32>
    %46 = tpu.concatenate %45, %44, %45 in 0 : vector<1x16xf32>, vector<32x16xf32>, vector<1x16xf32> -> vector<34x16xf32>
    %c144 = arith.constant 144 : index
    %c0_23 = arith.constant 0 : index
    %47 = vector.load %arg2[%c144, %c0_23] : memref<288x16xf32, #tpu.memory_space<vmem>>, vector<16x16xf32>
    %48 = vector.extract_strided_slice %46 {offsets = [0, 0], sizes = [32, 16], strides = [1, 1]} : vector<34x16xf32> to vector<32x16xf32>
    %cst_24 = arith.constant dense<0.000000e+00> : vector<32x16xf32>
    %49 = tpu.matmul %48, %47, %cst_24 {dimension_numbers = #tpu.dot_dimension_numbers<[1], [0], [0], [1], [0, 0, 1, 1], [], []>} : vector<32x16xf32>, vector<16x16xf32>, vector<32x16xf32> -> vector<32x16xf32>
    %c160 = arith.constant 160 : index
    %c0_25 = arith.constant 0 : index
    %50 = vector.load %arg2[%c160, %c0_25] : memref<288x16xf32, #tpu.memory_space<vmem>>, vector<16x16xf32>
    %51 = vector.extract_strided_slice %46 {offsets = [1, 0], sizes = [32, 16], strides = [1, 1]} : vector<34x16xf32> to vector<32x16xf32>
    %cst_26 = arith.constant dense<0.000000e+00> : vector<32x16xf32>
    %52 = tpu.matmul %51, %50, %cst_26 {dimension_numbers = #tpu.dot_dimension_numbers<[1], [0], [0], [1], [0, 0, 1, 1], [], []>} : vector<32x16xf32>, vector<16x16xf32>, vector<32x16xf32> -> vector<32x16xf32>
    %53 = arith.addf %49, %52 : vector<32x16xf32>
    %c176 = arith.constant 176 : index
    %c0_27 = arith.constant 0 : index
    %54 = vector.load %arg2[%c176, %c0_27] : memref<288x16xf32, #tpu.memory_space<vmem>>, vector<16x16xf32>
    %55 = vector.extract_strided_slice %46 {offsets = [2, 0], sizes = [32, 16], strides = [1, 1]} : vector<34x16xf32> to vector<32x16xf32>
    %cst_28 = arith.constant dense<0.000000e+00> : vector<32x16xf32>
    %56 = tpu.matmul %55, %54, %cst_28 {dimension_numbers = #tpu.dot_dimension_numbers<[1], [0], [0], [1], [0, 0, 1, 1], [], []>} : vector<32x16xf32>, vector<16x16xf32>, vector<32x16xf32> -> vector<32x16xf32>
    %57 = arith.addf %53, %56 : vector<32x16xf32>
    %c2 = arith.constant 2 : index
    %c0_29 = arith.constant 0 : index
    %58 = vector.load %arg3[%c2, %c0_29] : memref<5x16xf32, #tpu.memory_space<vmem>>, vector<1x16xf32>
    %59 = vector.broadcast %58 : vector<1x16xf32> to vector<32x16xf32>
    %60 = arith.addf %57, %59 : vector<32x16xf32>
    %61 = arith.addf %60, %26 : vector<32x16xf32>
    %cst_30 = arith.constant 0.000000e+00 : f32
    %62 = vector.broadcast %cst_30 : f32 to vector<32x16xf32>
    %63 = arith.maximumf %61, %62 : vector<32x16xf32>
    %cst_31 = arith.constant 0.000000e+00 : f32
    %64 = vector.broadcast %cst_31 : f32 to vector<1x16xf32>
    %65 = tpu.concatenate %64, %63, %64 in 0 : vector<1x16xf32>, vector<32x16xf32>, vector<1x16xf32> -> vector<34x16xf32>
    %c192 = arith.constant 192 : index
    %c0_32 = arith.constant 0 : index
    %66 = vector.load %arg2[%c192, %c0_32] : memref<288x16xf32, #tpu.memory_space<vmem>>, vector<16x16xf32>
    %67 = vector.extract_strided_slice %65 {offsets = [0, 0], sizes = [32, 16], strides = [1, 1]} : vector<34x16xf32> to vector<32x16xf32>
    %cst_33 = arith.constant dense<0.000000e+00> : vector<32x16xf32>
    %68 = tpu.matmul %67, %66, %cst_33 {dimension_numbers = #tpu.dot_dimension_numbers<[1], [0], [0], [1], [0, 0, 1, 1], [], []>} : vector<32x16xf32>, vector<16x16xf32>, vector<32x16xf32> -> vector<32x16xf32>
    %c208 = arith.constant 208 : index
    %c0_34 = arith.constant 0 : index
    %69 = vector.load %arg2[%c208, %c0_34] : memref<288x16xf32, #tpu.memory_space<vmem>>, vector<16x16xf32>
    %70 = vector.extract_strided_slice %65 {offsets = [1, 0], sizes = [32, 16], strides = [1, 1]} : vector<34x16xf32> to vector<32x16xf32>
    %cst_35 = arith.constant dense<0.000000e+00> : vector<32x16xf32>
    %71 = tpu.matmul %70, %69, %cst_35 {dimension_numbers = #tpu.dot_dimension_numbers<[1], [0], [0], [1], [0, 0, 1, 1], [], []>} : vector<32x16xf32>, vector<16x16xf32>, vector<32x16xf32> -> vector<32x16xf32>
    %72 = arith.addf %68, %71 : vector<32x16xf32>
    %c224 = arith.constant 224 : index
    %c0_36 = arith.constant 0 : index
    %73 = vector.load %arg2[%c224, %c0_36] : memref<288x16xf32, #tpu.memory_space<vmem>>, vector<16x16xf32>
    %74 = vector.extract_strided_slice %65 {offsets = [2, 0], sizes = [32, 16], strides = [1, 1]} : vector<34x16xf32> to vector<32x16xf32>
    %cst_37 = arith.constant dense<0.000000e+00> : vector<32x16xf32>
    %75 = tpu.matmul %74, %73, %cst_37 {dimension_numbers = #tpu.dot_dimension_numbers<[1], [0], [0], [1], [0, 0, 1, 1], [], []>} : vector<32x16xf32>, vector<16x16xf32>, vector<32x16xf32> -> vector<32x16xf32>
    %76 = arith.addf %72, %75 : vector<32x16xf32>
    %c3 = arith.constant 3 : index
    %c0_38 = arith.constant 0 : index
    %77 = vector.load %arg3[%c3, %c0_38] : memref<5x16xf32, #tpu.memory_space<vmem>>, vector<1x16xf32>
    %78 = vector.broadcast %77 : vector<1x16xf32> to vector<32x16xf32>
    %79 = arith.addf %76, %78 : vector<32x16xf32>
    %cst_39 = arith.constant 0.000000e+00 : f32
    %80 = vector.broadcast %cst_39 : f32 to vector<32x16xf32>
    %81 = arith.maximumf %79, %80 : vector<32x16xf32>
    %cst_40 = arith.constant 0.000000e+00 : f32
    %82 = vector.broadcast %cst_40 : f32 to vector<1x16xf32>
    %83 = tpu.concatenate %82, %81, %82 in 0 : vector<1x16xf32>, vector<32x16xf32>, vector<1x16xf32> -> vector<34x16xf32>
    %c240 = arith.constant 240 : index
    %c0_41 = arith.constant 0 : index
    %84 = vector.load %arg2[%c240, %c0_41] : memref<288x16xf32, #tpu.memory_space<vmem>>, vector<16x16xf32>
    %85 = vector.extract_strided_slice %83 {offsets = [0, 0], sizes = [32, 16], strides = [1, 1]} : vector<34x16xf32> to vector<32x16xf32>
    %cst_42 = arith.constant dense<0.000000e+00> : vector<32x16xf32>
    %86 = tpu.matmul %85, %84, %cst_42 {dimension_numbers = #tpu.dot_dimension_numbers<[1], [0], [0], [1], [0, 0, 1, 1], [], []>} : vector<32x16xf32>, vector<16x16xf32>, vector<32x16xf32> -> vector<32x16xf32>
    %c256 = arith.constant 256 : index
    %c0_43 = arith.constant 0 : index
    %87 = vector.load %arg2[%c256, %c0_43] : memref<288x16xf32, #tpu.memory_space<vmem>>, vector<16x16xf32>
    %88 = vector.extract_strided_slice %83 {offsets = [1, 0], sizes = [32, 16], strides = [1, 1]} : vector<34x16xf32> to vector<32x16xf32>
    %cst_44 = arith.constant dense<0.000000e+00> : vector<32x16xf32>
    %89 = tpu.matmul %88, %87, %cst_44 {dimension_numbers = #tpu.dot_dimension_numbers<[1], [0], [0], [1], [0, 0, 1, 1], [], []>} : vector<32x16xf32>, vector<16x16xf32>, vector<32x16xf32> -> vector<32x16xf32>
    %90 = arith.addf %86, %89 : vector<32x16xf32>
    %c272 = arith.constant 272 : index
    %c0_45 = arith.constant 0 : index
    %91 = vector.load %arg2[%c272, %c0_45] : memref<288x16xf32, #tpu.memory_space<vmem>>, vector<16x16xf32>
    %92 = vector.extract_strided_slice %83 {offsets = [2, 0], sizes = [32, 16], strides = [1, 1]} : vector<34x16xf32> to vector<32x16xf32>
    %cst_46 = arith.constant dense<0.000000e+00> : vector<32x16xf32>
    %93 = tpu.matmul %92, %91, %cst_46 {dimension_numbers = #tpu.dot_dimension_numbers<[1], [0], [0], [1], [0, 0, 1, 1], [], []>} : vector<32x16xf32>, vector<16x16xf32>, vector<32x16xf32> -> vector<32x16xf32>
    %94 = arith.addf %90, %93 : vector<32x16xf32>
    %c4 = arith.constant 4 : index
    %c0_47 = arith.constant 0 : index
    %95 = vector.load %arg3[%c4, %c0_47] : memref<5x16xf32, #tpu.memory_space<vmem>>, vector<1x16xf32>
    %96 = vector.broadcast %95 : vector<1x16xf32> to vector<32x16xf32>
    %97 = arith.addf %94, %96 : vector<32x16xf32>
    %98 = arith.addf %97, %63 : vector<32x16xf32>
    %cst_48 = arith.constant 0.000000e+00 : f32
    %99 = vector.broadcast %cst_48 : f32 to vector<32x16xf32>
    %100 = arith.maximumf %98, %99 : vector<32x16xf32>
    %c0_49 = arith.constant 0 : index
    %c0_50 = arith.constant 0 : index
    %101 = vector.load %arg4[%c0_49, %c0_50] : memref<4x32xf32, #tpu.memory_space<vmem>>, vector<4x32xf32>
    %cst_51 = arith.constant dense<0.000000e+00> : vector<4x16xf32>
    %102 = tpu.matmul %101, %100, %cst_51 {dimension_numbers = #tpu.dot_dimension_numbers<[1], [0], [0], [1], [0, 0, 1, 1], [], []>} : vector<4x32xf32>, vector<32x16xf32>, vector<4x16xf32> -> vector<4x16xf32>
    %c64_52 = arith.constant 64 : index
    %c0_53 = arith.constant 0 : index
    %103 = vector.load %arg5[%c64_52, %c0_53] : memref<65x8xf32, #tpu.memory_space<vmem>>, vector<1x8xf32>
    %104 = vector.extract_strided_slice %102 {offsets = [0, 0], sizes = [1, 16], strides = [1, 1]} : vector<4x16xf32> to vector<1x16xf32>
    %c0_54 = arith.constant 0 : index
    %c0_55 = arith.constant 0 : index
    %105 = vector.load %arg5[%c0_54, %c0_55] : memref<65x8xf32, #tpu.memory_space<vmem>>, vector<16x8xf32>
    %cst_56 = arith.constant dense<0.000000e+00> : vector<1x8xf32>
    %106 = tpu.matmul %104, %105, %cst_56 {dimension_numbers = #tpu.dot_dimension_numbers<[1], [0], [0], [1], [0, 0, 1, 1], [], []>} : vector<1x16xf32>, vector<16x8xf32>, vector<1x8xf32> -> vector<1x8xf32>
    %107 = arith.addf %103, %106 : vector<1x8xf32>
    %108 = vector.extract_strided_slice %102 {offsets = [1, 0], sizes = [1, 16], strides = [1, 1]} : vector<4x16xf32> to vector<1x16xf32>
    %c16 = arith.constant 16 : index
    %c0_57 = arith.constant 0 : index
    %109 = vector.load %arg5[%c16, %c0_57] : memref<65x8xf32, #tpu.memory_space<vmem>>, vector<16x8xf32>
    %cst_58 = arith.constant dense<0.000000e+00> : vector<1x8xf32>
    %110 = tpu.matmul %108, %109, %cst_58 {dimension_numbers = #tpu.dot_dimension_numbers<[1], [0], [0], [1], [0, 0, 1, 1], [], []>} : vector<1x16xf32>, vector<16x8xf32>, vector<1x8xf32> -> vector<1x8xf32>
    %111 = arith.addf %107, %110 : vector<1x8xf32>
    %112 = vector.extract_strided_slice %102 {offsets = [2, 0], sizes = [1, 16], strides = [1, 1]} : vector<4x16xf32> to vector<1x16xf32>
    %c32_59 = arith.constant 32 : index
    %c0_60 = arith.constant 0 : index
    %113 = vector.load %arg5[%c32_59, %c0_60] : memref<65x8xf32, #tpu.memory_space<vmem>>, vector<16x8xf32>
    %cst_61 = arith.constant dense<0.000000e+00> : vector<1x8xf32>
    %114 = tpu.matmul %112, %113, %cst_61 {dimension_numbers = #tpu.dot_dimension_numbers<[1], [0], [0], [1], [0, 0, 1, 1], [], []>} : vector<1x16xf32>, vector<16x8xf32>, vector<1x8xf32> -> vector<1x8xf32>
    %115 = arith.addf %111, %114 : vector<1x8xf32>
    %116 = vector.extract_strided_slice %102 {offsets = [3, 0], sizes = [1, 16], strides = [1, 1]} : vector<4x16xf32> to vector<1x16xf32>
    %c48 = arith.constant 48 : index
    %c0_62 = arith.constant 0 : index
    %117 = vector.load %arg5[%c48, %c0_62] : memref<65x8xf32, #tpu.memory_space<vmem>>, vector<16x8xf32>
    %cst_63 = arith.constant dense<0.000000e+00> : vector<1x8xf32>
    %118 = tpu.matmul %116, %117, %cst_63 {dimension_numbers = #tpu.dot_dimension_numbers<[1], [0], [0], [1], [0, 0, 1, 1], [], []>} : vector<1x16xf32>, vector<16x8xf32>, vector<1x8xf32> -> vector<1x8xf32>
    %119 = arith.addf %115, %118 : vector<1x8xf32>
    %c0_64 = arith.constant 0 : index
    %c0_65 = arith.constant 0 : index
    %c0_66 = arith.constant 0 : index
    %120 = vector.load %arg6[%c0_64, %c0_65, %c0_66] : memref<1x1x8xf32, #tpu.memory_space<vmem>>, vector<1x1x8xf32>
    %121 = vector.shape_cast %120 : vector<1x1x8xf32> to vector<1x8xf32>
    %122 = vector.shape_cast %119 : vector<1x8xf32> to vector<1x1x8xf32>
    tpu.vector_store %arg6[%c0_64, %c0_65, %c0_66], %122 {strides = array<i32>} : memref<1x1x8xf32, #tpu.memory_space<vmem>>, vector<1x1x8xf32>,
    return
  }
  func.func @transform_0(%arg0: i32) -> (i32, i32, i32) {
    %c0_i32 = arith.constant 0 : i32
    %c0_i32_0 = arith.constant 0 : i32
    %c0_i32_1 = arith.constant 0 : i32
    return %arg0, %c0_i32, %c0_i32_0 : i32, i32, i32
  }
  func.func @transform_1(%arg0: i32) -> (i32, i32) {
    %c0_i32 = arith.constant 0 : i32
    %c0_i32_0 = arith.constant 0 : i32
    %c0_i32_1 = arith.constant 0 : i32
    return %c0_i32, %c0_i32_0 : i32, i32
  }
  func.func @transform_2(%arg0: i32) -> (i32, i32) {
    %c0_i32 = arith.constant 0 : i32
    %c0_i32_0 = arith.constant 0 : i32
    %c0_i32_1 = arith.constant 0 : i32
    return %c0_i32, %c0_i32_0 : i32, i32
  }
  func.func @transform_3(%arg0: i32) -> (i32, i32) {
    %c0_i32 = arith.constant 0 : i32
    %c0_i32_0 = arith.constant 0 : i32
    %c0_i32_1 = arith.constant 0 : i32
    return %c0_i32, %c0_i32_0 : i32, i32
  }
  func.func @transform_4(%arg0: i32) -> (i32, i32) {
    %c0_i32 = arith.constant 0 : i32
    %c0_i32_0 = arith.constant 0 : i32
    %c0_i32_1 = arith.constant 0 : i32
    return %c0_i32, %c0_i32_0 : i32, i32
  }
  func.func @transform_5(%arg0: i32) -> (i32, i32, i32) {
    %c0_i32 = arith.constant 0 : i32
    %c0_i32_0 = arith.constant 0 : i32
    %c0_i32_1 = arith.constant 0 : i32
    return %arg0, %c0_i32, %c0_i32_0 : i32, i32, i32
  }
}

</mosaic_0001>

<bundles_post_ra>
// kernel: bacteria_nn_forward.1
= control target key start
LH: loop header
LB: loop body
LE: loop exit
PB: predicated region body
PF: predicated region fallthrough
CT: control target
= control target key end

     0   :  { %10 = vsyncpa [#allocation3], 0  ;;  %s3422_s0 = inlined_call_operand.vmem [shape: f32[2,32,32], index: 0, kind: input, shape index: {}]   ;;  %s3423_s1 = inlined_call_operand.vmem [shape: f32[288,16], index: 1, kind: input, shape index: {}]   ;;  %s3424_s2 = inlined_call_operand.vmem [shape: f32[5,16], index: 2, kind: input, shape index: {}]   ;;  %s3425_s3 = inlined_call_operand.vmem [shape: f32[4,32], index: 3, kind: input, shape index: {}]   ;;  %s3426_s4 = inlined_call_operand.vmem [shape: f32[65,8], index: 4, kind: input, shape index: {}]   ;;  %s3427_s5 = inlined_call_operand.hbm [shape: f32[2,1,8], index: 5, kind: output, shape index: {}]  }
   0x1   :  { %12 = vsyncpa [#allocation3 + $0x1], 0  ;;  %s2963_s18 = smov 0   ;;  %s2965_s19 = smov 0  }
   0x2   :  { %s2967_s20 = smov 0   ;;  %s2969_s21 = smov 0  }
   0x3 LB: > { %s2984_s22 = sadd.s32 4294967295, %s2928_s21   ;;  %s2433_s23 = sadd.s32 4294967294, %s2928_s21   ;;  %s2928_s21 = sphi %s2969_s21, %s3433_s21   ;;  %s2924_s20 = sphi %s2967_s20, %s3432_s20   ;;  %s2920_s19 = sphi %s2965_s19, %s3431_s19   ;;  %s2916_s18 = sphi %s2963_s18, %s3430_s18  }
   0x4   : > { %s2988_s24 = sadd.s32 1, %s2928_s21   ;;  %s135_s25 = sadd.s32 1, %s2924_s20 }
   0x5   : > { %s132_s26 = ssub.s32 %s2928_s21, %s2988_s24  ;;  %p145_p0 = scmp.ne.s32.totalorder %s2924_s20, %s2920_s19 }
   0x6   : > { %p133_p1 = scmp.eq.s32.totalorder %s132_s26, 0  ;;  %p146_p2 = scmp.eq.s32.totalorder %s2984_s22, 1 }
   0x7   : > { %p151_p3 = scmp.ne.s32.totalorder %s2920_s19, %s2916_s18  ;;  %p152_p4 = scmp.eq.s32.totalorder %s2433_s23, 1 }
   0x8   : > { %s2999_s27 = scalar_select %p133_p1, %s2924_s20, %s135_s25  }
   0x9   : > { %p3001_p5 = por %p146_p2, %p145_p0  ;;  %p3005_p6 = por %p152_p4, %p151_p3 }
   0xa   : > { %p2436_p7 = scmp.ge.s32.totalorder %s2928_s21, 1  ;;  %p190_p8 = scmp.lt.s32.totalorder %s2928_s21, 3 }
   0xc   : > { %p191_p9 = pnand %p2436_p7, %p190_p8 }
   0xd   : > { %p217_p10 = scmp.lt.s32.totalorder (!%p191_p9), %s2984_s22, 1  ;;  %s215_s16 = sand.u32 (!%p191_p9), 1, %s2920_s19  }
   0xe   : > { %194 = sbr.rel (%p191_p9) target bundleno = 1547 (0x60b), region = 40  ;;  %s216_s23 = scalar_lea.vmem (!%p191_p9), [#allocation2], %s215_s16 }
   0xf   : > { %s2378_s25 = sshll.u32 (!%p191_p9), %s216_s23, 4  ;;  %s2366_s7 = scalar_lea.sflag (!%p191_p9), [#allocation3], %s215_s16  ;;  %s2379_s25 = int_to_ptr.vmem [resolvable:$true] %s2378_s25 }
  0x10   : > { %s2868_s8 = scalar_lea.vmem (!%p191_p9), %s2379_s25, 16 }
  0x11   : > { %p2869_p11 = scmp.ne.s32.totalorder (!%p191_p9), %s2379_s25, %s2868_s8 }
  0x13   : > { %v249_v0 = vld [vmem:[%s3423_s1 + $0x38] sm:$0xff]  ;;  %v248_v2 = vld [vmem:[%s3423_s1 + $0x30] sm:$0xff]  ;;  %v247_v4 = vld [vmem:[%s3423_s1 + $0x28] sm:$0xff]  ;;  %s218_s17 = scalar_select %p217_p10, %s2984_s22, 1  ;;  %vm230_vm0 = vcmask 1040384   ;;  %vm262_vm1 = vcmask 261120  }
  0x14   : > { %v245_v1 = vld [vmem:[%s3423_s1 + $0x18] sm:$0xff]  ;;  %2626 = vmatprep.subr.mxu0 %v249_v0  ;;  %v244_v3 = vld [vmem:[%s3423_s1 + $0x10] sm:$0xff]  ;;  %v243_v5 = vld [vmem:[%s3423_s1 + $0x8] sm:$0xff]  ;;  %vm252_vm2 = vcmask 1046528   ;;  %vm453_vm3 = vcmask 1045504   ;;  %vm657_vm4 = vcmask 130048   ;;  %p2870_p12 = pnand %p2869_p11, %p3001_p5 }
  0x15   : > { %2640 = vmatprep.subr.mxu1 %v245_v1  ;;  %2627 = vmatpush3.msra.mxu0 %v249_v0  ;;  %v246_v6 = vld [vmem:[%s3423_s1 + $0x20] sm:$0xff]  ;;  %s2512_s6 = sshll.u32 %s218_s17, 5  ;;  %v452_v8 = vld [vmem:[%s3423_s1 + $0x58] sm:$0xff]  ;;  %v451_v31 = vld [vmem:[%s3423_s1 + $0x50] sm:$0xff]  ;;  %vm2931_vm5 = vmmov 0   ;;  %s2509_s17 = sshll.u32 %s2984_s22, 4 }
  0x16   : > { %2641 = vmatpush3.msra.mxu1 %v245_v1  ;;  %2628 = vmatprep.subr.mxu0 %v248_v2  ;;  %v242_v7 = vld [vmem:[%s3423_s1] sm:$0xff]  ;;  %s221_s9 = scalar_lea.vmem %s3422_s0, %s2512_s6  ;;  %v450_v35 = vld [vmem:[%s3423_s1 + $0x48] sm:$0xff]  ;;  %v645_v43 = vld [vmem:[%s3423_s1 + $0x78] sm:$0xff]  ;;  %vm2363_vm6 = vcmask 57344   ;;  %s3387_s6 = scalar_lea.hbm %s3427_s5, %s2509_s17 }
  0x17   : > { %2642 = vmatprep.subr.mxu1 %v244_v3  ;;  %2629 = vmatpush3.msra.mxu0 %v248_v2  ;;  %v222_v9 = vld [vmem:[%s221_s9] sm:$0xff]  ;;  %v223_v10 = vld [vmem:[%s221_s9 + $0x8] sm:$0xff]  ;;  %v224_v11 = vld [vmem:[%s221_s9 + $0x10] sm:$0xff]  ;;  %p2871_p13 = pneg %p2870_p12  ;;  %s2932_s22 = smov [#allocation2]  }
  0x18   : > { %2643 = vmatpush3.msra.mxu1 %v244_v3  ;;  %2630 = vmatprep.subr.mxu0 %v247_v4  ;;  %v231_v12 = vrot.slane %v222_v9, 7  ;;  %v232_v13 = vrot.slane %v223_v10, 7  ;;  %v234_v14 = vrot.slane %v224_v11, 7  ;;  %v225_v15 = vld [vmem:[%s221_s9 + $0x18] sm:$0xff]  ;;  %v449_v38 = vld [vmem:[%s3423_s1 + $0x40] sm:$0xff]  ;;  %v643_v44 = vld [vmem:[%s3423_s1 + $0x68] sm:$0xff] }
  0x19   : > { %2644 = vmatprep.subr.mxu1 %v243_v5  ;;  %2631 = vmatpush3.msra.mxu0 %v247_v4  ;;  %v236_v16 = vrot.slane %v225_v15, 7  ;;  %v642_v45 = vld [vmem:[%s3423_s1 + $0x60] sm:$0xff]  ;;  %v644_v46 = vld [vmem:[%s3423_s1 + $0x70] sm:$0xff]  ;;  %v3092_v47 = vld [vmem:[%s3423_s1 + $0x88] sm:$0xff]  ;;  %s2872_s9 = sshll.u32 %s2932_s22, 4  ;;  %s2873_s9 = int_to_ptr.vmem [resolvable:$false] %s2872_s9 }
  0x1a   : > { %2645 = vmatpush3.msra.mxu1 %v243_v5  ;;  %2632 = vmatprep.subr.mxu0 %v246_v6  ;;  %v233_v17 = vsel %vm230_vm0, %v231_v12, %v232_v13  ;;  %v240_v18 = vsel %vm230_vm0, 0.0, %v231_v12  ;;  %v235_v19 = vsel %vm230_vm0, %v232_v13, %v234_v14  ;;  %v2451_v57 = vld [vmem:[%s3424_s2] ss:$0 sm:$0xff]  ;;  %s2874_s10 = scalar_lea.vmem %s2873_s9, 32  ;;  %p2875_p0 = scmp.lt.s32.totalorder %s2379_s25, %s2873_s9 }
  0x1b   : > { %2646 = vmatprep.subr.mxu1 %v242_v7  ;;  %2633 = vmatpush3.msra.mxu0 %v246_v6  ;;  %v253_v20 = vrot.slane %v240_v18, 1  ;;  %v254_v21 = vrot.slane %v233_v17, 1  ;;  %v256_v22 = vrot.slane %v235_v19, 1  ;;  %v237_v23 = vsel %vm230_vm0, %v234_v14, %v236_v16  ;;  %p2876_p1 = scmp.lt.s32.totalorder %s2874_s10, %s2868_s8 }
  0x1c   : > { %2647 = vmatpush3.msra.mxu1 %v242_v7  ;;  %2654 = vmatprep.subr.mxu0 %v452_v8  ;;  %v241_v24 = vsel %vm230_vm0, %v236_v16, 0.0  ;;  %v454_v25 = vrot.slane %v240_v18, 2  ;;  %v455_v26 = vrot.slane %v233_v17, 2  ;;  %v258_v29 = vrot.slane %v237_v23, 1 }
  0x1d   : > { %2648 = vmatprep.mubr.msk.f32.mxu1 %vm262_vm1, %v240_v18  ;;  %v255_v27 = vsel %vm252_vm2, %v253_v20, %v254_v21  ;;  %v257_v28 = vsel %vm252_vm2, %v254_v21, %v256_v22  ;;  %v260_v30 = vrot.slane %v241_v24, 1  ;;  %v457_v33 = vrot.slane %v235_v19, 2  ;;  %2668 = vmatprep.subr.mxu1 %v645_v43  ;;  %p2877_p2 = por %p2876_p1, %p2875_p0 }
  0x1e   : > { %2649 = vmatmul.mubr.msk.f32.vlgmr.msra.gmra.mxu1 %vm262_vm1, %v233_v17  ;;  %2634 = vmatprep.mubr.msk.f32.mxu0 %vm262_vm1, %v255_v27  ;;  %v259_v32 = vsel %vm252_vm2, %v256_v22, %v258_v29  ;;  %v456_v36 = vsel %vm453_vm3, %v454_v25, %v455_v26  ;;  %v459_v37 = vrot.slane %v237_v23, 2  ;;  %v461_v40 = vrot.slane %v241_v24, 2 }
  0x1f   : > { %2651 = vmatprep.mubr.msk.f32.mxu1 %vm262_vm1, %v235_v19  ;;  %2635 = vmatmul.mubr.msk.f32.vlgmr.msra.gmra.mxu0 %vm262_vm1, %v257_v28  ;;  %v261_v34 = vsel %vm252_vm2, %v258_v29, %v260_v30  ;;  %v458_v39 = vsel %vm453_vm3, %v455_v26, %v457_v33  ;;  %p2878_p3 = pnand %p2877_p2, %p2871_p13 }
  0x20   : > { %2655 = vmatpush3.msra.mxu0 %v452_v8  ;;  %2637 = vmatprep.mubr.msk.f32.mxu0 %vm262_vm1, %v259_v32  ;;  %v460_v41 = vsel %vm453_vm3, %v457_v33, %v459_v37  ;;  %v462_v42 = vsel %vm453_vm3, %v459_v37, %v461_v40 }
  0x21   : > { %2656 = vmatprep.subr.mxu0 %v451_v31  ;;  %2669 = vmatpush3.msra.mxu1 %v645_v43 }
  0x22   : > { %2652 = vmatmul.mubr.msk.f32.gmra.mxu1 %vm262_vm1, %v237_v23  ;;  %2657 = vmatpush3.msra.mxu0 %v451_v31 }
  0x23   : > { %2638 = vmatmul.mubr.msk.f32.gmra.mxu0 %vm262_vm1, %v261_v34  ;;  %2658 = vmatprep.subr.mxu0 %v450_v35 }
  0x24   : > { %2659 = vmatpush3.msra.mxu0 %v450_v35  ;;  %2662 = vmatprep.mubr.msk.f32.mxu0 %vm262_vm1, %v456_v36 }
  0x25   : > { %2660 = vmatprep.subr.mxu0 %v449_v38  ;;  %2670 = vmatprep.subr.mxu1 %v644_v46 }
  0x26   : > { %2661 = vmatpush3.msra.mxu0 %v449_v38  ;;  %2671 = vmatpush3.msra.mxu1 %v644_v46 }
  0x27   : > { %2663 = vmatmul.mubr.msk.f32.vlgmr.msra.gmra.mxu0 %vm262_vm1, %v458_v39  ;;  %2678 = vmatprep.subr.mxu0 %v643_v44 }
  0x28   : > { %2665 = vmatprep.mubr.msk.f32.mxu0 %vm262_vm1, %v460_v41  ;;  %2679 = vmatpush3.msra.mxu0 %v643_v44 }
  0x29   : > { %2680 = vmatprep.subr.mxu0 %v642_v45  ;;  %2688 = vmatprep.subr.mxu1 %v3092_v47 }
  0x2a   : > { %2681 = vmatpush3.msra.mxu0 %v642_v45 }
  0x2b   : > { %2666 = vmatmul.mubr.msk.f32.gmra.mxu0 %vm262_vm1, %v462_v42 }
  0xde   : > { %v2650_v48 = vpop.f32.mrf.mxu1 }
  0xdf   : > { %v2636_v49 = vpop.f32.mrf.mxu0 }
  0xe0   : > { %v430_v51 = vpop.f32.mrf.mxu1  ;;  %v436_v55 = vadd.f32 %v2650_v48, %v2636_v49 }
  0xe1   : > { %v337_v50 = vpop.f32.mrf.mxu0 }
  0xe2   : > { %v2653_v53 = vpop.f32.mrf.mxu1  ;;  %v431_v58 = vadd.f32 %v430_v51, %v337_v50 }
  0xe3   : > { %v2639_v52 = vpop.f32.mrf.mxu0 }
  0xe4   : > { %v440_v60 = vpop.f32.mrf.mxu1  ;;  %v446_v62 = vadd.f32 %v2653_v53, %v2639_v52 }
  0xe5   : > { %v347_v54 = vpop.f32.mrf.mxu0 }
  0xe6   : > { %v441_v2 = vadd.f32 %v440_v60, %v347_v54 }
  0xe7   : > { %v2664_v56 = vpop.f32.mrf.mxu0 }
  0xe8   : > { %v557_v59 = vadd.f32 %v2664_v56, %v436_v55 }
  0xe9   : > { %v537_v61 = vpop.f32.mrf.mxu0 }
  0xea   : > { %v566_v63 = vadd.f32 %v2451_v57, %v557_v59  ;;  %v556_v0 = vadd.f32 %v537_v61, %v431_v58 }
  0xeb   : > { %v2667_v1 = vpop.f32.mrf.mxu0 }
  0xec   : > { %v570_v3 = vmax.f32 %v566_v63, 0.0  ;;  %v565_v4 = vadd.f32 %v2451_v57, %v556_v0  ;;  %v559_v5 = vadd.f32 %v2667_v1, %v446_v62  ;;  %v844_v1 = vld [vmem:[%s3423_s1 + $0x80] sm:$0xff] }
  0xed   : > { %v547_v6 = vpop.f32.mrf.mxu0 }
  0xee   : > { %v569_v7 = vmax.f32 %v565_v4, 0.0  ;;  %v568_v8 = vadd.f32 %v2451_v57, %v559_v5  ;;  %v558_v9 = vadd.f32 %v547_v6, %v441_v2  ;;  %v578_v10 = vrot.slane %v570_v3, 7 }
  0xf0   : > { %v577_v11 = vrot.slane %v569_v7, 7  ;;  %v572_v12 = vmax.f32 %v568_v8, 0.0  ;;  %v567_v13 = vadd.f32 %v2451_v57, %v558_v9 }
  0xf2   : > { %v579_v14 = vsel %vm230_vm0, %v577_v11, %v578_v10  ;;  %v589_v15 = vsel %vm230_vm0, -inf, %v577_v11  ;;  %v582_v16 = vrot.slane %v572_v12, 7  ;;  %v571_v17 = vmax.f32 %v567_v13, 0.0  ;;  %v981_v12 = vld [vmem:[%s3423_s1 + $0x98] sm:$0xff]  ;;  %v980_v13 = vld [vmem:[%s3423_s1 + $0x90] sm:$0xff] }
  0xf3   : > { %v593_v18 = vrot.slane %v589_v15, 1  ;;  %v594_v19 = vrot.slane %v579_v14, 1  ;;  %v610_v20 = vrot.slane %v589_v15, 2  ;;  %v611_v21 = vrot.slane %v579_v14, 2 }
  0xf4   : > { %v590_v22 = vsel %vm230_vm0, %v582_v16, -inf  ;;  %v580_v23 = vrot.slane %v571_v17, 7 }
  0xf5   : > { %v595_v24 = vsel %vm252_vm2, %v593_v18, %v594_v19  ;;  %v600_v25 = vrot.slane %v590_v22, 1  ;;  %v612_v29 = vsel %vm453_vm3, %v610_v20, %v611_v21  ;;  %v617_v35 = vrot.slane %v590_v22, 2 }
  0xf6   : > { %v606_v26 = vmax.f32 %v589_v15, %v595_v24  ;;  %v581_v27 = vsel %vm230_vm0, %v578_v10, %v580_v23  ;;  %v583_v28 = vsel %vm230_vm0, %v580_v23, %v582_v16  ;;  %v982_v15 = vld [vmem:[%s3423_s1 + $0xa0] sm:$0xff]  ;;  %v1182_v16 = vld [vmem:[%s3423_s1 + $0xb8] sm:$0xff] }
  0xf7   : > { %v596_v30 = vrot.slane %v581_v27, 1  ;;  %v598_v31 = vrot.slane %v583_v28, 1  ;;  %v613_v32 = vrot.slane %v581_v27, 2  ;;  %v615_v33 = vrot.slane %v583_v28, 2 }
  0xf8   : > { %v3105_v34 = vmax.f32 %v606_v26, %v612_v29  ;;  %v2464_v26 = vld [vmem:[%s3424_s2 + $0x1] ss:$0 sm:$0xff] }
  0xf9   : > { %v597_v36 = vsel %vm252_vm2, %v594_v19, %v596_v30  ;;  %v599_v37 = vsel %vm252_vm2, %v596_v30, %v598_v31  ;;  %v601_v38 = vsel %vm252_vm2, %v598_v31, %v600_v25  ;;  %v614_v43 = vsel %vm453_vm3, %v611_v21, %v613_v32 }
  0xfa   : > { %v607_v39 = vmax.f32 %v579_v14, %v597_v36  ;;  %v608_v40 = vmax.f32 %v581_v27, %v599_v37  ;;  %v609_v41 = vmax.f32 %v583_v28, %v601_v38  ;;  %v631_v42 = vrot.slane %v3105_v34, 7  ;;  %v983_v14 = vld [vmem:[%s3423_s1 + $0xa8] sm:$0xff] }
  0xfb   : > { %v616_v44 = vsel %vm453_vm3, %v613_v32, %v615_v33  ;;  %v618_v45 = vsel %vm453_vm3, %v615_v33, %v617_v35  ;;  %2698 = vmatprep.subr.mxu0 %v983_v14 }
  0xfc   : > { %v640_v46 = vsel %vm230_vm0, 0.0, %v631_v42  ;;  %v3115_v48 = vmax.f32 %v607_v39, %v614_v43  ;;  %v3117_v49 = vmax.f32 %v608_v40, %v616_v44  ;;  %v3119_v50 = vmax.f32 %v609_v41, %v618_v45 }
  0xfd   : > { %2682 = vmatprep.mubr.msk.f32.mxu0 %vm657_vm4, %v640_v46  ;;  %v648_v54 = vrot.slane %v640_v46, 1  ;;  %v846_v4 = vrot.slane %v640_v46, 2 }
  0xfe   : > { %v632_v51 = vrot.slane %v3115_v48, 7  ;;  %v634_v52 = vrot.slane %v3117_v49, 7  ;;  %v636_v53 = vrot.slane %v3119_v50, 7 }
 0x100   : > { %v633_v55 = vsel %vm230_vm0, %v631_v42, %v632_v51  ;;  %v635_v56 = vsel %vm230_vm0, %v632_v51, %v634_v52  ;;  %v637_v57 = vsel %vm230_vm0, %v634_v52, %v636_v53  ;;  %v641_v61 = vsel %vm230_vm0, %v636_v53, 0.0 }
 0x101   : > { %2683 = vmatmul.mubr.msk.f32.vlgmr.msra.gmra.mxu0 %vm657_vm4, %v633_v55  ;;  %v651_v58 = vrot.slane %v635_v56, 1  ;;  %v649_v59 = vrot.slane %v633_v55, 1  ;;  %v653_v60 = vrot.slane %v637_v57, 1  ;;  %v655_v0 = vrot.slane %v641_v61, 1 }
 0x102   : > { %2685 = vmatprep.mubr.msk.f32.mxu0 %vm657_vm4, %v635_v56  ;;  %v847_v3 = vrot.slane %v633_v55, 2  ;;  %v849_v5 = vrot.slane %v635_v56, 2  ;;  %v851_v7 = vrot.slane %v637_v57, 2  ;;  %v853_v10 = vrot.slane %v641_v61, 2  ;;  %2699 = vmatpush3.msra.mxu0 %v983_v14  ;;  %v1322_v14 = vld [vmem:[%s3423_s1 + $0xc8] sm:$0xff] }
 0x103   : > { %v650_v62 = vsel %vm252_vm2, %v648_v54, %v649_v59  ;;  %v652_v63 = vsel %vm252_vm2, %v649_v59, %v651_v58  ;;  %v654_v2 = vsel %vm252_vm2, %v651_v58, %v653_v60  ;;  %v656_v6 = vsel %vm252_vm2, %v653_v60, %v655_v0  ;;  %2700 = vmatprep.subr.mxu0 %v982_v15 }
 0x104   : > { %2672 = vmatprep.mubr.msk.f32.mxu1 %vm657_vm4, %v650_v62  ;;  %v848_v8 = vsel %vm453_vm3, %v846_v4, %v847_v3  ;;  %v850_v9 = vsel %vm453_vm3, %v847_v3, %v849_v5  ;;  %v854_v11 = vsel %vm453_vm3, %v851_v7, %v853_v10  ;;  %2701 = vmatpush3.msra.mxu0 %v982_v15  ;;  %v1181_v3 = vld [vmem:[%s3423_s1 + $0xb0] sm:$0xff]  ;;  %v1321_v15 = vld [vmem:[%s3423_s1 + $0xc0] sm:$0xff] }
 0x105   : > { %2673 = vmatmul.mubr.msk.f32.vlgmr.msra.gmra.mxu1 %vm657_vm4, %v652_v63  ;;  %2686 = vmatmul.mubr.msk.f32.gmra.mxu0 %vm657_vm4, %v637_v57 }
 0x106   : > { %2675 = vmatprep.mubr.msk.f32.mxu1 %vm657_vm4, %v654_v2  ;;  %2689 = vmatpush3.msra.mxu1 %v3092_v47  ;;  %v852_v47 = vsel %vm453_vm3, %v849_v5, %v851_v7 }
 0x107   : > { %2690 = vmatprep.subr.mxu1 %v844_v1  ;;  %2718 = vmatprep.subr.mxu0 %v1182_v16 }
 0x108   : > { %2691 = vmatpush3.msra.mxu1 %v844_v1 }
 0x109   : > { %2676 = vmatmul.mubr.msk.f32.gmra.mxu1 %vm657_vm4, %v656_v6  ;;  %2708 = vmatprep.subr.mxu1 %v981_v12 }
 0x10a   : > { %2692 = vmatprep.mubr.msk.f32.mxu1 %vm657_vm4, %v848_v8 }
 0x10d   : > { %2693 = vmatmul.mubr.msk.f32.vlgmr.msra.gmra.mxu1 %vm657_vm4, %v850_v9 }
 0x10e   : > { %2695 = vmatprep.mubr.msk.f32.mxu1 %vm657_vm4, %v852_v47  ;;  %2709 = vmatpush3.msra.mxu1 %v981_v12 }
 0x10f   : > { %2710 = vmatprep.subr.mxu1 %v980_v13 }
 0x110   : > { %2711 = vmatpush3.msra.mxu1 %v980_v13 }
 0x111   : > { %2696 = vmatmul.mubr.msk.f32.gmra.mxu1 %vm657_vm4, %v854_v11 }
 0x1c1   : > { %v2684_v17 = vpop.f32.mrf.mxu0 }
 0x1c3   : > { %v825_v20 = vpop.f32.mrf.mxu0 }
 0x1c5   : > { %v2674_v18 = vpop.f32.mrf.mxu1  ;;  %v2687_v24 = vpop.f32.mrf.mxu0 }
 0x1c6   : > { %v831_v23 = vadd.f32 %v2684_v17, %v2674_v18  ;;  %v1323_v17 = vld [vmem:[%s3423_s1 + $0xd0] sm:$0xff]  ;;  %v1523_v18 = vld [vmem:[%s3423_s1 + $0xe8] sm:$0xff] }
 0x1c7   : > { %v732_v19 = vpop.f32.mrf.mxu1  ;;  %v835_v33 = vpop.f32.mrf.mxu0 }
 0x1c8   : > { %v826_v27 = vadd.f32 %v825_v20, %v732_v19 }
 0x1c9   : > { %v2677_v21 = vpop.f32.mrf.mxu1 }
 0x1ca   : > { %v841_v30 = vadd.f32 %v2687_v24, %v2677_v21 }
 0x1cb   : > { %v742_v22 = vpop.f32.mrf.mxu1 }
 0x1cc   : > { %v836_v36 = vadd.f32 %v835_v33, %v742_v22 }
 0x1cd   : > { %v2694_v25 = vpop.f32.mrf.mxu1 }
 0x1ce   : > { %v949_v28 = vadd.f32 %v2694_v25, %v831_v23 }
 0x1cf   : > { %v929_v29 = vpop.f32.mrf.mxu1 }
 0x1d0   : > { %v958_v31 = vadd.f32 %v2464_v26, %v949_v28  ;;  %v948_v32 = vadd.f32 %v929_v29, %v826_v27  ;;  %v2477_v28 = vld [vmem:[%s3424_s2 + $0x2] ss:$0 sm:$0xff] }
 0x1d1   : > { %v2697_v35 = vpop.f32.mrf.mxu1 }
 0x1d2   : > { %v962_v37 = vmax.f32 %v958_v31, 0.0  ;;  %v957_v38 = vadd.f32 %v2464_v26, %v948_v32  ;;  %v951_v39 = vadd.f32 %v2697_v35, %v841_v30 }
 0x1d3   : > { %v939_v40 = vpop.f32.mrf.mxu1 }
 0x1d4   : > { %v961_v41 = vmax.f32 %v957_v38, 0.0  ;;  %v960_v42 = vadd.f32 %v2464_v26, %v951_v39  ;;  %v950_v43 = vadd.f32 %v939_v40, %v836_v36  ;;  %v970_v44 = vrot.slane %v962_v37, 7 }
 0x1d6   : > { %v969_v45 = vrot.slane %v961_v41, 7  ;;  %v964_v46 = vmax.f32 %v960_v42, 0.0  ;;  %v959_v51 = vadd.f32 %v2464_v26, %v950_v43 }
 0x1d8   : > { %v971_v52 = vsel %vm230_vm0, %v969_v45, %v970_v44  ;;  %v963_v53 = vmax.f32 %v959_v51, 0.0  ;;  %v978_v54 = vsel %vm230_vm0, 0.0, %v969_v45  ;;  %v974_v57 = vrot.slane %v964_v46, 7 }
 0x1d9   : > { %v986_v55 = vrot.slane %v978_v54, 1  ;;  %2712 = vmatprep.mubr.msk.f32.mxu1 %vm657_vm4, %v978_v54  ;;  %v987_v56 = vrot.slane %v971_v52, 1  ;;  %v1183_v4 = vrot.slane %v978_v54, 2  ;;  %v1184_v5 = vrot.slane %v971_v52, 2 }
 0x1da   : > { %v972_v58 = vrot.slane %v963_v53, 7  ;;  %2713 = vmatmul.mubr.msk.f32.vlgmr.msra.gmra.mxu1 %vm657_vm4, %v971_v52  ;;  %v979_v0 = vsel %vm230_vm0, %v974_v57, 0.0 }
 0x1db   : > { %v988_v59 = vsel %vm252_vm2, %v986_v55, %v987_v56  ;;  %v993_v6 = vrot.slane %v979_v0, 1  ;;  %v1185_v10 = vsel %vm453_vm3, %v1183_v4, %v1184_v5  ;;  %v1190_v12 = vrot.slane %v979_v0, 2 }
 0x1dc   : > { %2702 = vmatprep.mubr.msk.f32.mxu0 %vm657_vm4, %v988_v59  ;;  %v973_v60 = vsel %vm230_vm0, %v970_v44, %v972_v58  ;;  %v975_v61 = vsel %vm230_vm0, %v972_v58, %v974_v57 }
 0x1dd   : > { %v989_v62 = vrot.slane %v973_v60, 1  ;;  %2715 = vmatprep.mubr.msk.f32.mxu1 %vm657_vm4, %v973_v60  ;;  %v991_v63 = vrot.slane %v975_v61, 1  ;;  %v1186_v7 = vrot.slane %v973_v60, 2  ;;  %v1188_v9 = vrot.slane %v975_v61, 2 }
 0x1de   : > { %2716 = vmatmul.mubr.msk.f32.gmra.mxu1 %vm657_vm4, %v975_v61 }
 0x1df   : > { %v990_v1 = vsel %vm252_vm2, %v987_v56, %v989_v62  ;;  %v992_v2 = vsel %vm252_vm2, %v989_v62, %v991_v63  ;;  %v994_v8 = vsel %vm252_vm2, %v991_v63, %v993_v6  ;;  %v1187_v47 = vsel %vm453_vm3, %v1184_v5, %v1186_v7  ;;  %v1522_v5 = vld [vmem:[%s3423_s1 + $0xe0] sm:$0xff] }
 0x1e0   : > { %2703 = vmatmul.mubr.msk.f32.vlgmr.msra.gmra.mxu0 %vm657_vm4, %v990_v1  ;;  %v1189_v11 = vsel %vm453_vm3, %v1186_v7, %v1188_v9  ;;  %v1191_v13 = vsel %vm453_vm3, %v1188_v9, %v1190_v12 }
 0x1e1   : > { %2705 = vmatprep.mubr.msk.f32.mxu0 %vm657_vm4, %v992_v2  ;;  %2719 = vmatpush3.msra.mxu0 %v1182_v16  ;;  %v1324_v16 = vld [vmem:[%s3423_s1 + $0xd8] sm:$0xff] }
 0x1e2   : > { %2720 = vmatprep.subr.mxu0 %v1181_v3  ;;  %2728 = vmatprep.subr.mxu1 %v1324_v16 }
 0x1e3   : > { %2721 = vmatpush3.msra.mxu0 %v1181_v3  ;;  %2729 = vmatpush3.msra.mxu1 %v1324_v16  ;;  %v1659_v16 = vld [vmem:[%s3423_s1 + $0xf8] sm:$0xff] }
 0x1e4   : > { %2706 = vmatmul.mubr.msk.f32.gmra.mxu0 %vm657_vm4, %v994_v8  ;;  %2738 = vmatprep.subr.mxu0 %v1322_v14 }
 0x1e5   : > { %2722 = vmatprep.mubr.msk.f32.mxu0 %vm657_vm4, %v1185_v10  ;;  %2730 = vmatprep.subr.mxu1 %v1323_v17 }
 0x1e6   : > { %2731 = vmatpush3.msra.mxu1 %v1323_v17  ;;  %v1658_v17 = vld [vmem:[%s3423_s1 + $0xf0] sm:$0xff] }
 0x1e7   : > { %2748 = vmatprep.subr.mxu1 %v1523_v18 }
 0x1e8   : > { %2723 = vmatmul.mubr.msk.f32.vlgmr.msra.gmra.mxu0 %vm657_vm4, %v1187_v47 }
 0x1e9   : > { %2725 = vmatprep.mubr.msk.f32.mxu0 %vm657_vm4, %v1189_v11  ;;  %2739 = vmatpush3.msra.mxu0 %v1322_v14 }
 0x1ea   : > { %2740 = vmatprep.subr.mxu0 %v1321_v15 }
 0x1eb   : > { %2741 = vmatpush3.msra.mxu0 %v1321_v15 }
 0x1ec   : > { %2726 = vmatmul.mubr.msk.f32.gmra.mxu0 %vm657_vm4, %v1191_v13 }
 0x29a   : > { %v2714_v19 = vpop.f32.mrf.mxu1 }
 0x29c   : > { %v1162_v22 = vpop.f32.mrf.mxu1 }
 0x29e   : > { %v2717_v26 = vpop.f32.mrf.mxu1 }
 0x2a0   : > { %v2704_v20 = vpop.f32.mrf.mxu0  ;;  %v1172_v36 = vpop.f32.mrf.mxu1 }
 0x2a1   : > { %v1168_v25 = vadd.f32 %v2714_v19, %v2704_v20  ;;  %v1660_v19 = vld [vmem:[%s3423_s1 + $0x100] sm:$0xff]  ;;  %v1860_v20 = vld [vmem:[%s3423_s1 + $0x118] sm:$0xff] }
 0x2a2   : > { %v1069_v21 = vpop.f32.mrf.mxu0 }
 0x2a3   : > { %v1163_v29 = vadd.f32 %v1162_v22, %v1069_v21 }
 0x2a4   : > { %v2707_v23 = vpop.f32.mrf.mxu0 }
 0x2a5   : > { %v1178_v32 = vadd.f32 %v2717_v26, %v2707_v23 }
 0x2a6   : > { %v1079_v24 = vpop.f32.mrf.mxu0 }
 0x2a7   : > { %v1173_v38 = vadd.f32 %v1172_v36, %v1079_v24 }
 0x2a8   : > { %v2724_v27 = vpop.f32.mrf.mxu0 }
 0x2a9   : > { %v1286_v30 = vadd.f32 %v2724_v27, %v1168_v25 }
 0x2aa   : > { %v1266_v31 = vpop.f32.mrf.mxu0 }
 0x2ab   : > { %v1295_v33 = vadd.f32 %v2477_v28, %v1286_v30  ;;  %v1285_v35 = vadd.f32 %v1266_v31, %v1163_v29  ;;  %v2490_v30 = vld [vmem:[%s3424_s2 + $0x3] ss:$0 sm:$0xff] }
 0x2ac   : > { %v2727_v37 = vpop.f32.mrf.mxu0 }
 0x2ad   : > { %v3217_v39 = vadd.f32 %v1295_v33, %v3115_v48  ;;  %v1294_v40 = vadd.f32 %v2477_v28, %v1285_v35  ;;  %v1288_v41 = vadd.f32 %v2727_v37, %v1178_v32 }
 0x2ae   : > { %v1276_v42 = vpop.f32.mrf.mxu0 }
 0x2af   : > { %v1303_v43 = vmax.f32 %v3217_v39, 0.0  ;;  %v3221_v44 = vadd.f32 %v1294_v40, %v3105_v34  ;;  %v1297_v45 = vadd.f32 %v2477_v28, %v1288_v41  ;;  %v1287_v46 = vadd.f32 %v1276_v42, %v1173_v38  ;;  %v1984_v39 = vld [vmem:[%s3425_s3] sm:$0xf] }
 0x2b1   : > { %v1302_v51 = vmax.f32 %v3221_v44, 0.0  ;;  %v3225_v52 = vadd.f32 %v1297_v45, %v3119_v50  ;;  %v1296_v53 = vadd.f32 %v2477_v28, %v1287_v46  ;;  %v1311_v48 = vrot.slane %v1303_v43, 7  ;;  %v2059_v44 = vld [vmem:[%s3426_s4] sm:$0xff] }
 0x2b3   : > { %v1305_v54 = vmax.f32 %v3225_v52, 0.0  ;;  %v3231_v55 = vadd.f32 %v1296_v53, %v3117_v49  ;;  %v1310_v34 = vrot.slane %v1302_v51, 7 }
 0x2b5   : > { %v1304_v56 = vmax.f32 %v3231_v55, 0.0  ;;  %v1319_v57 = vsel %vm230_vm0, 0.0, %v1310_v34  ;;  %v1312_v58 = vsel %vm230_vm0, %v1310_v34, %v1311_v48  ;;  %v1315_v60 = vrot.slane %v1305_v54, 7 }
 0x2b6   : > { %v1327_v50 = vrot.slane %v1319_v57, 1  ;;  %2742 = vmatprep.mubr.msk.f32.mxu0 %vm657_vm4, %v1319_v57  ;;  %v1328_v59 = vrot.slane %v1312_v58, 1  ;;  %v1524_v6 = vrot.slane %v1319_v57, 2  ;;  %v1525_v7 = vrot.slane %v1312_v58, 2 }
 0x2b7   : > { %v1313_v49 = vrot.slane %v1304_v56, 7  ;;  %2743 = vmatmul.mubr.msk.f32.vlgmr.msra.gmra.mxu0 %vm657_vm4, %v1312_v58  ;;  %v1320_v2 = vsel %vm230_vm0, %v1315_v60, 0.0 }
 0x2b8   : > { %v1329_v61 = vsel %vm252_vm2, %v1327_v50, %v1328_v59  ;;  %v1334_v8 = vrot.slane %v1320_v2, 1  ;;  %v1526_v11 = vsel %vm453_vm3, %v1524_v6, %v1525_v7  ;;  %v1531_v14 = vrot.slane %v1320_v2, 2 }
 0x2b9   : > { %2732 = vmatprep.mubr.msk.f32.mxu1 %vm657_vm4, %v1329_v61  ;;  %v1314_v62 = vsel %vm230_vm0, %v1311_v48, %v1313_v49  ;;  %v1316_v63 = vsel %vm230_vm0, %v1313_v49, %v1315_v60 }
 0x2ba   : > { %v1330_v0 = vrot.slane %v1314_v62, 1  ;;  %2745 = vmatprep.mubr.msk.f32.mxu0 %vm657_vm4, %v1314_v62  ;;  %v1332_v1 = vrot.slane %v1316_v63, 1  ;;  %v1527_v9 = vrot.slane %v1314_v62, 2  ;;  %v1529_v47 = vrot.slane %v1316_v63, 2 }
 0x2bb   : > { %2746 = vmatmul.mubr.msk.f32.gmra.mxu0 %vm657_vm4, %v1316_v63 }
 0x2bc   : > { %v1331_v3 = vsel %vm252_vm2, %v1328_v59, %v1330_v0  ;;  %v1333_v4 = vsel %vm252_vm2, %v1330_v0, %v1332_v1  ;;  %v1335_v10 = vsel %vm252_vm2, %v1332_v1, %v1334_v8  ;;  %v1528_v12 = vsel %vm453_vm3, %v1525_v7, %v1527_v9 }
 0x2bd   : > { %2733 = vmatmul.mubr.msk.f32.vlgmr.msra.gmra.mxu1 %vm657_vm4, %v1331_v3  ;;  %v1530_v13 = vsel %vm453_vm3, %v1527_v9, %v1529_v47  ;;  %v1532_v15 = vsel %vm453_vm3, %v1529_v47, %v1531_v14  ;;  %v1859_v47 = vld [vmem:[%s3423_s1 + $0x110] sm:$0xff] }
 0x2be   : > { %2735 = vmatprep.mubr.msk.f32.mxu1 %vm657_vm4, %v1333_v4  ;;  %2749 = vmatpush3.msra.mxu1 %v1523_v18  ;;  %v1661_v18 = vld [vmem:[%s3423_s1 + $0x108] sm:$0xff] }
 0x2bf   : > { %2750 = vmatprep.subr.mxu1 %v1522_v5  ;;  %2758 = vmatprep.subr.mxu0 %v1661_v18 }
 0x2c0   : > { %2751 = vmatpush3.msra.mxu1 %v1522_v5  ;;  %2759 = vmatpush3.msra.mxu0 %v1661_v18 }
 0x2c1   : > { %2736 = vmatmul.mubr.msk.f32.gmra.mxu1 %vm657_vm4, %v1335_v10  ;;  %2768 = vmatprep.subr.mxu1 %v1659_v16 }
 0x2c2   : > { %2752 = vmatprep.mubr.msk.f32.mxu1 %vm657_vm4, %v1526_v11  ;;  %2760 = vmatprep.subr.mxu0 %v1660_v19 }
 0x2c3   : > { %2761 = vmatpush3.msra.mxu0 %v1660_v19 }
 0x2c4   : > { %2778 = vmatprep.subr.mxu0 %v1860_v20 }
 0x2c5   : > { %2753 = vmatmul.mubr.msk.f32.vlgmr.msra.gmra.mxu1 %vm657_vm4, %v1528_v12 }
 0x2c6   : > { %2755 = vmatprep.mubr.msk.f32.mxu1 %vm657_vm4, %v1530_v13  ;;  %2769 = vmatpush3.msra.mxu1 %v1659_v16 }
 0x2c7   : > { %2770 = vmatprep.subr.mxu1 %v1658_v17 }
 0x2c8   : > { %2771 = vmatpush3.msra.mxu1 %v1658_v17 }
 0x2c9   : > { %2756 = vmatmul.mubr.msk.f32.gmra.mxu1 %vm657_vm4, %v1532_v15 }
 0x377   : > { %v2744_v21 = vpop.f32.mrf.mxu0 }
 0x379   : > { %v1503_v24 = vpop.f32.mrf.mxu0 }
 0x37b   : > { %v2747_v28 = vpop.f32.mrf.mxu0 }
 0x37d   : > { %v2734_v22 = vpop.f32.mrf.mxu1  ;;  %v1513_v38 = vpop.f32.mrf.mxu0 }
 0x37e   : > { %v1509_v27 = vadd.f32 %v2744_v21, %v2734_v22  ;;  %v2930_v22 = vmov 0.0  }
 0x37f   : > { %v1410_v23 = vpop.f32.mrf.mxu1  ;;  %2788 = vmatprep.subr.mxu1 %v2930_v22 }
 0x380   : > { %v1504_v31 = vadd.f32 %v1503_v24, %v1410_v23  ;;  %v2136_v23 = vld [vmem:[%s3426_s4 + $0x18] sm:$0xff] }
 0x381   : > { %v2737_v25 = vpop.f32.mrf.mxu1 }
 0x382   : > { %v1519_v35 = vadd.f32 %v2747_v28, %v2737_v25 }
 0x383   : > { %v1420_v26 = vpop.f32.mrf.mxu1 }
 0x384   : > { %v1514_v41 = vadd.f32 %v1513_v38, %v1420_v26 }
 0x385   : > { %v2754_v29 = vpop.f32.mrf.mxu1 }
 0x386   : > { %v1627_v32 = vadd.f32 %v2754_v29, %v1509_v27 }
 0x387   : > { %v1607_v33 = vpop.f32.mrf.mxu1 }
 0x388   : > { %v1636_v36 = vadd.f32 %v2490_v30, %v1627_v32  ;;  %v1626_v37 = vadd.f32 %v1607_v33, %v1504_v31 }
 0x389   : > { %v2757_v40 = vpop.f32.mrf.mxu1 }
 0x38a   : > { %v1640_v42 = vmax.f32 %v1636_v36, 0.0  ;;  %v1635_v45 = vadd.f32 %v2490_v30, %v1626_v37  ;;  %v1629_v46 = vadd.f32 %v2757_v40, %v1519_v35  ;;  %v2503_v40 = vld [vmem:[%s3424_s2 + $0x4] ss:$0 sm:$0xff] }
 0x38b   : > { %v1617_v53 = vpop.f32.mrf.mxu1 }
 0x38c   : > { %v1639_v48 = vmax.f32 %v1635_v45, 0.0  ;;  %v1638_v34 = vadd.f32 %v2490_v30, %v1629_v46  ;;  %v1628_v57 = vadd.f32 %v1617_v53, %v1514_v41  ;;  %v1648_v58 = vrot.slane %v1640_v42, 7 }
 0x38e   : > { %v1647_v50 = vrot.slane %v1639_v48, 7  ;;  %v1642_v59 = vmax.f32 %v1638_v34, 0.0  ;;  %v1637_v60 = vadd.f32 %v2490_v30, %v1628_v57 }
 0x390   : > { %v1649_v49 = vsel %vm230_vm0, %v1647_v50, %v1648_v58  ;;  %v1641_v61 = vmax.f32 %v1637_v60, 0.0  ;;  %v1656_v62 = vsel %vm230_vm0, 0.0, %v1647_v50  ;;  %v1652_v1 = vrot.slane %v1642_v59, 7 }
 0x391   : > { %v1664_v63 = vrot.slane %v1656_v62, 1  ;;  %2772 = vmatprep.mubr.msk.f32.mxu1 %vm657_vm4, %v1656_v62  ;;  %v1665_v0 = vrot.slane %v1649_v49, 1  ;;  %v1861_v11 = vrot.slane %v1656_v62, 2  ;;  %v1862_v12 = vrot.slane %v1649_v49, 2 }
 0x392   : > { %v1650_v2 = vrot.slane %v1641_v61, 7  ;;  %2773 = vmatmul.mubr.msk.f32.vlgmr.msra.gmra.mxu1 %vm657_vm4, %v1649_v49  ;;  %v1657_v8 = vsel %vm230_vm0, %v1652_v1, 0.0 }
 0x393   : > { %v1666_v3 = vsel %vm252_vm2, %v1664_v63, %v1665_v0  ;;  %v1671_v13 = vrot.slane %v1657_v8, 1  ;;  %v1863_v17 = vsel %vm453_vm3, %v1861_v11, %v1862_v12  ;;  %v1868_v21 = vrot.slane %v1657_v8, 2 }
 0x394   : > { %2762 = vmatprep.mubr.msk.f32.mxu0 %vm657_vm4, %v1666_v3  ;;  %v1651_v4 = vsel %vm230_vm0, %v1648_v58, %v1650_v2  ;;  %v1653_v5 = vsel %vm230_vm0, %v1650_v2, %v1652_v1  ;;  %v2211_v1 = vld [vmem:[%s3426_s4 + $0x20] sm:$0xff]  ;;  %v2288_v2 = vld [vmem:[%s3426_s4 + $0x38] sm:$0xff] }
 0x395   : > { %v1667_v6 = vrot.slane %v1651_v4, 1  ;;  %2775 = vmatprep.mubr.msk.f32.mxu1 %vm657_vm4, %v1651_v4  ;;  %v1669_v7 = vrot.slane %v1653_v5, 1  ;;  %v1864_v14 = vrot.slane %v1651_v4, 2  ;;  %v1866_v16 = vrot.slane %v1653_v5, 2 }
 0x396   : > { %2776 = vmatmul.mubr.msk.f32.gmra.mxu1 %vm657_vm4, %v1653_v5  ;;  %v2287_v5 = vld [vmem:[%s3426_s4 + $0x30] sm:$0xff] }
 0x397   : > { %v1668_v9 = vsel %vm252_vm2, %v1665_v0, %v1667_v6  ;;  %v1670_v10 = vsel %vm252_vm2, %v1667_v6, %v1669_v7  ;;  %v1672_v15 = vsel %vm252_vm2, %v1669_v7, %v1671_v13  ;;  %v1865_v18 = vsel %vm453_vm3, %v1862_v12, %v1864_v14  ;;  %2796 = vmatprep.mubr.msk.f32.mxu1 %vm2931_vm5, %v2930_v22  ;;  %v2058_v7 = vld [vmem:[%s3426_s4 + $0x40] sm:$0x1] }
 0x398   : > { %2763 = vmatmul.mubr.msk.f32.vlgmr.msra.gmra.mxu0 %vm657_vm4, %v1668_v9  ;;  %v1867_v19 = vsel %vm453_vm3, %v1864_v14, %v1866_v16 }
 0x399   : > { %2765 = vmatprep.mubr.msk.f32.mxu0 %vm657_vm4, %v1670_v10  ;;  %2779 = vmatpush3.msra.mxu0 %v1860_v20  ;;  %v1869_v20 = vsel %vm453_vm3, %v1866_v16, %v1868_v21 }
 0x39a   : > { %2780 = vmatprep.subr.mxu0 %v1859_v47 }
 0x39b   : > { %2781 = vmatpush3.msra.mxu0 %v1859_v47 }
 0x39c   : > { %2766 = vmatmul.mubr.msk.f32.gmra.mxu0 %vm657_vm4, %v1672_v15  ;;  %2806 = vmatprep.subr.mxu0 %v2930_v22 }
 0x39d   : > { %2782 = vmatprep.mubr.msk.f32.mxu0 %vm657_vm4, %v1863_v17 }
 0x3a0   : > { %2783 = vmatmul.mubr.msk.f32.vlgmr.msra.gmra.mxu0 %vm657_vm4, %v1865_v18 }
 0x3a1   : > { %2785 = vmatprep.mubr.msk.f32.mxu0 %vm657_vm4, %v1867_v19  ;;  %2807 = vmatpush3.msra.mxu0 %v2136_v23 }
 0x3a2   : > { %2808 = vmatprep.subr.mxu0 %v2930_v22 }
 0x3a4   : > { %2786 = vmatmul.mubr.msk.f32.gmra.mxu0 %vm657_vm4, %v1869_v20 }
 0x3a5   : > { %2810 = vmatprep.mubr.msk.f32.mxu0 %vm2931_vm5, %v2930_v22 }
 0x452   : > { %v2774_v24 = vpop.f32.mrf.mxu1 }
 0x454   : > { %v1840_v27 = vpop.f32.mrf.mxu1 }
 0x456   : > { %v2777_v30 = vpop.f32.mrf.mxu1 }
 0x458   : > { %v2764_v25 = vpop.f32.mrf.mxu0  ;;  %v1850_v38 = vpop.f32.mrf.mxu1 }
 0x459   : > { %v1846_v32 = vadd.f32 %v2774_v24, %v2764_v25 }
 0x45a   : > { %v1747_v26 = vpop.f32.mrf.mxu0 }
 0x45b   : > { %v1841_v35 = vadd.f32 %v1840_v27, %v1747_v26 }
 0x45c   : > { %v2767_v28 = vpop.f32.mrf.mxu0 }
 0x45d   : > { %v1856_v36 = vadd.f32 %v2777_v30, %v2767_v28 }
 0x45e   : > { %v1757_v29 = vpop.f32.mrf.mxu0 }
 0x45f   : > { %v1851_v42 = vadd.f32 %v1850_v38, %v1757_v29 }
 0x460   : > { %v2784_v31 = vpop.f32.mrf.mxu0 }
 0x461   : > { %v1964_v37 = vadd.f32 %v2784_v31, %v1846_v32 }
 0x462   : > { %v1944_v33 = vpop.f32.mrf.mxu0 }
 0x463   : > { %v1963_v45 = vadd.f32 %v1944_v33, %v1841_v35  ;;  %v1973_v48 = vadd.f32 %v2503_v40, %v1964_v37 }
 0x464   : > { %v2787_v41 = vpop.f32.mrf.mxu0 }
 0x465   : > { %v1966_v46 = vadd.f32 %v2787_v41, %v1856_v36  ;;  %v1972_v58 = vadd.f32 %v2503_v40, %v1963_v45  ;;  %v1977_v60 = vadd.f32 %v1973_v48, %v1303_v43  ;;  %v2060_v43 = vld [vmem:[%s3426_s4 + $0x8] sm:$0xff] }
 0x466   : > { %v1954_v53 = vpop.f32.mrf.mxu0 }
 0x467   : > { %v1975_v34 = vadd.f32 %v2503_v40, %v1966_v46  ;;  %v1965_v57 = vadd.f32 %v1954_v53, %v1851_v42  ;;  %v1976_v62 = vadd.f32 %v1972_v58, %v1302_v51  ;;  %v1981_v0 = vmax.f32 %v1977_v60, 0.0  ;;  %v2135_v51 = vld [vmem:[%s3426_s4 + $0x10] sm:$0xff] }
 0x468   : > { %2809 = vmatpush3.msra.mxu0 %v2135_v51 }
 0x469   : > { %v1979_v50 = vadd.f32 %v1975_v34, %v1305_v54  ;;  %v1974_v59 = vadd.f32 %v2503_v40, %v1965_v57  ;;  %v1980_v52 = vmax.f32 %v1976_v62, 0.0  ;;  %2820 = vmatprep.subr.mxu0 %v2930_v22  ;;  %v2212_v54 = vld [vmem:[%s3426_s4 + $0x28] sm:$0xff] }
 0x46b   : > { %v1983_v49 = vmax.f32 %v1979_v50, 0.0  ;;  %v1978_v61 = vadd.f32 %v1974_v59, %v1304_v56 }
 0x46d   : > { %v1982_v63 = vmax.f32 %v1978_v61, 0.0  ;;  %2789 = vmatpush3.msra.mxu1 %v1983_v49 }
 0x46e   : > { %2790 = vmatprep.subr.mxu1 %v2930_v22 }
 0x46f   : > { %2791 = vmatpush3.msra.mxu1 %v1982_v63 }
 0x470   : > { %2792 = vmatprep.subr.mxu1 %v2930_v22 }
 0x471   : > { %2793 = vmatpush3.msra.mxu1 %v1981_v0 }
 0x472   : > { %2794 = vmatprep.subr.mxu1 %v2930_v22 }
 0x473   : > { %2795 = vmatpush3.msra.mxu1 %v1980_v52 }
 0x474   : > { %2797 = vmatmul.mubr.msk.f32.vlgmr.msra.gmra.mxu1 %vm262_vm1, %v1984_v39  ;;  %2799 = vmatprep.subr.mxu1 %v2930_v22 }
 0x475   : > { %2800 = vmatpush3.msra.mxu1 %v2060_v43  ;;  %2803 = vmatprep.mubr.msk.f32.mxu1 %vm2931_vm5, %v2930_v22 }
 0x476   : > { %2801 = vmatprep.subr.mxu1 %v2930_v22 }
 0x477   : > { %2802 = vmatpush3.msra.mxu1 %v2059_v44 }
 0x478   : > { %2813 = vmatprep.subr.mxu1 %v2930_v22 }
 0x534   : > { %v2054_v55 = vpop.f32.mrf.mxu1 }
 0x535   : > { %v2137_v56 = vrot.slane %v2054_v55, 1  ;;  %2804 = vmatmul.mubr.msk.f32.vlgmr.msra.gmra.mxu1 %vm657_vm4, %v2054_v55  ;;  %v2213_v4 = vrot.slane %v2054_v55, 2  ;;  %v2289_v6 = vrot.slane %v2054_v55, 3 }
 0x536   : > { %v2798_v3 = vpop.f32.mrf.mxu1  ;;  %2814 = vmatpush3.msra.mxu1 %v2212_v54  ;;  %2817 = vmatprep.mubr.msk.f32.mxu1 %vm2931_vm5, %v2930_v22 }
 0x537   : > { %2811 = vmatmul.mubr.msk.f32.vlgmr.msra.gmra.mxu0 %vm657_vm4, %v2137_v56  ;;  %2815 = vmatprep.subr.mxu1 %v2930_v22 }
 0x538   : > { %2816 = vmatpush3.msra.mxu1 %v2211_v1  ;;  %2821 = vmatpush3.msra.mxu0 %v2288_v2 }
 0x539   : > { %2818 = vmatmul.mubr.msk.f32.vlgmr.msra.gmra.mxu1 %vm657_vm4, %v2213_v4  ;;  %2822 = vmatprep.subr.mxu0 %v2930_v22 }
 0x53a   : > { %2823 = vmatpush3.msra.mxu0 %v2287_v5  ;;  %2824 = vmatprep.mubr.msk.f32.mxu0 %vm2931_vm5, %v2930_v22 }
 0x53b   : > { %2825 = vmatmul.mubr.msk.f32.vlgmr.msra.gmra.mxu0 %vm657_vm4, %v2289_v6 }
 0x5f5   : > { %v2130_v8 = vpop.f32.mrf.mxu1 }
 0x5f6   : > { %v2134_v9 = vadd.f32 %v2130_v8, %v2058_v7 }
 0x5f7   : > { %v2805_v10 = vpop.f32.mrf.mxu1  ;;  %v2206_v47 = vpop.f32.mrf.mxu0 }
 0x5f8   : > { %v2210_v11 = vadd.f32 %v2206_v47, %v2134_v9 }
 0x5f9   : > { %v2812_v12 = vpop.f32.mrf.mxu0  ;;  %v2282_v13 = vpop.f32.mrf.mxu1 }
 0x5fa   : > { %v2286_v14 = vadd.f32 %v2282_v13, %v2210_v11 }
 0x5fb   : > { %v2819_v15 = vpop.f32.mrf.mxu1  ;;  %v2358_v16 = vpop.f32.mrf.mxu0 }
 0x5fc   : > { %v2362_v17 = vadd.f32 %v2358_v16, %v2286_v14 }
 0x5fd   : > { %v2826_v18 = vpop.f32.mrf.mxu0 }
 0x5fe   : > { %2364 = vst.msk [vmem:[%s216_s23] sm:$0x1] %vm2363_vm6, %v2362_v17 }
 0x5ff   : > { %2881 = shalt.err (!%p2878_p3)
}
 0x600   : > { %s2882_s11 = scalar_lea.hbm %s3387_s6, 16  ;;  %s2886_s14 = scalar_lea.hbm %s3427_s5, 32 }
 0x601   : > { %p2883_p4 = scmp.ne.s32.totalorder %s3387_s6, %s2882_s11  ;;  %p2887_p9 = scmp.lt.s32.totalorder %s3387_s6, %s3427_s5 }
 0x602   : > { %p2888_p10 = scmp.lt.s32.totalorder %s2886_s14, %s2882_s11 }
 0x603   : > { %p2884_p7 = pnand %p2883_p4, %p3001_p5 }
 0x604   : > { %p2889_p11 = por %p2888_p10, %p2887_p9 }
 0x605   : > { %p2885_p8 = pneg %p2884_p7 }
 0x607   : > { %p2890_p12 = pnand %p2889_p11, %p2885_p8 }
 0x609   : > { %2893 = shalt.err (!%p2890_p12)
}
 0x60a   : > { %2827 = dma.vmem_to_hbm [thread:$0]  (%p3001_p5), %s2379_s25, 16, %s3387_s6, %s2366_s7  }
 0x60b PF: > { %p2833_p13 = scmp.ge.s32.totalorder %s2928_s21, 2  ;;  %s2390_s17 = sand.u32 1, %s2916_s18  }
 0x60c   : > { %s2391_s23 = scalar_lea.sflag [#allocation3], %s2390_s17 }
 0x60d   : > { %p2830_p0 = pnand %p2833_p13, %p3005_p6 }
 0x60f   : > { %p2831_p1 = pneg %p2830_p0 }
 0x611   : > { %2911 = dma.done.wait (%p2831_p1), %s2391_s23, 16  }
 0x612   : > { %2913 = vsyncadd (%p2831_p1), %s2391_s23, 4294967280  ;;  %p15_p2 = scmp.ge.s32.totalorder %s2988_s24, 4   ;;  %s3430_s18 = smov %s2920_s19 }
 0x613   : > { %s3431_s19 = smov %s2924_s20  ;;  %s3432_s20 = smov %s2999_s27 }
 0x614   : > { %s3433_s21 = smov %s2988_s24  ;;  %17 = sbr.rel (!%p15_p2) target bundleno = 3 (0x3), region = 75 }
 0x619   :  { %2395 = vsyncpa [#allocation3], 1 }
 0x61a   :  { %2397 = vsyncpa [#allocation3 + $0x1], 1 }

</bundles_post_ra>
